<compile_context>
chip_gen: v6e
topology: v6e:2x2x1
jax: 0.10.0
libtpu: 0.0.40
codegen_flags: <defaults>
</compile_context>

<pallas_src>
import jax
import jax.numpy as jnp
from jax.experimental import pallas as pl
from jax.experimental.pallas import tpu as pltpu

EPS = 1e-5  # nn.GroupNorm default eps


def _vmem_limit_bytes():
    """Generation-aware VMEM limit: ~75% of physical capacity, capped at 100 MiB."""
    try:
        cap = int(pltpu.get_tpu_info().vmem_capacity_bytes)
    except Exception:
        cap = 64 * 1024 * 1024
    return min(cap * 3 // 4, 100 * 1024 * 1024)


# ---------------------------------------------------------------------------
# Kernel 1: 3x3x3 conv (pad=1) as 3 deep-K GEMMs per (sample, depth-slice) step,
#           with per-tile per-channel GroupNorm sum/sumsq partials fused in.
# ---------------------------------------------------------------------------
def _conv3d_gn_stats(x_pad, w_taps, bias, dims, out_dtype):
    """x_pad : (N, D+2, Cin, (H+2)*(W+2))  compute dtype (bf16)
       w_taps: (3, Cout, 9*Cin)            compute dtype; [kd, co, (kh*3+kw)*Cin + ci]
       bias  : (Cout, 1)                   f32
       returns y (N, D, Cout, L) out_dtype and stats (N, D, Cout, 2) f32,
       where L = (H-1)*(W+2) + W and output lane p encodes (h, w) as p = h*(W+2) + w."""
    n, _, cin, hpwp = x_pad.shape
    d, h, w = dims
    wp = w + 2
    L = (h - 1) * wp + w
    cout = w_taps.shape[1]

    def kernel(x0_ref, x1_ref, x2_ref, w_ref, b_ref, y_ref, s_ref):
        xs = (x0_ref, x1_ref, x2_ref)
        acc = jnp.zeros((cout, L), jnp.float32)
        for kd in range(3):
            xk = xs[kd][0, 0]                                   # (Cin, HpWp) bf16
            rows = []
            for kh in range(3):
                for kw in range(3):
                    off = kh * wp + kw                          # static lane offset
                    rows.append(xk[:, off:off + L])
            patch = jnp.concatenate(rows, axis=0)               # (9*Cin, L), built in VMEM
            acc = acc + jnp.dot(w_ref[kd], patch,
                                preferred_element_type=jnp.float32)
        acc = acc + b_ref[...]                                  # (Cout, L) + (Cout, 1)
        y_ref[0, 0] = acc.astype(y_ref.dtype)

        # GroupNorm partials: lane-only masked reduction to per-channel sums; the tiny
        # depth/group reduction happens in XLA so both grid axes stay "parallel".
        lane = jax.lax.broadcasted_iota(jnp.int32, (1, L), 1)
        mask = ((lane % wp) < w).astype(jnp.float32)            # valid output lanes
        am = acc * mask
        s_ref[0, 0] = jnp.concatenate(
            [jnp.sum(am, axis=-1, keepdims=True),
             jnp.sum(am * acc, axis=-1, keepdims=True)], axis=1)

    def _x_spec(kd):
        return pl.BlockSpec((1, 1, cin, hpwp),
                            lambda gi, gj, kd=kd: (gi, gj + kd, 0, 0))

    return pl.pallas_call(
        kernel,
        grid=(n, d),
        in_specs=[
            _x_spec(0), _x_spec(1), _x_spec(2),
            pl.BlockSpec((3, cout, 9 * cin), lambda gi, gj: (0, 0, 0)),
            pl.BlockSpec((cout, 1), lambda gi, gj: (0, 0)),
        ],
        out_specs=(
            pl.BlockSpec((1, 1, cout, L), lambda gi, gj: (gi, gj, 0, 0)),
            pl.BlockSpec((1, 1, cout, 2), lambda gi, gj: (gi, gj, 0, 0)),
        ),
        out_shape=(
            jax.ShapeDtypeStruct((n, d, cout, L), out_dtype),
            jax.ShapeDtypeStruct((n, d, cout, 2), jnp.float32),
        ),
        compiler_params=pltpu.CompilerParams(
            dimension_semantics=("parallel", "parallel"),
            vmem_limit_bytes=_vmem_limit_bytes()),
    )(x_pad, x_pad, x_pad, w_taps, bias)


# ---------------------------------------------------------------------------
# XLA finalize: fold per-tile partials into per-channel GroupNorm scale/shift
# ---------------------------------------------------------------------------
def _gn_scale_shift(stats, gamma, beta, groups, spatial_count):
    n, _, c, _ = stats.shape
    cpg = c // groups
    per_c = jnp.sum(stats, axis=1)                               # (N, C, 2)
    su = per_c[..., 0].reshape(n, groups, cpg).sum(-1)           # (N, G)
    sq = per_c[..., 1].reshape(n, groups, cpg).sum(-1)
    cnt = float(cpg * spatial_count)
    mean = su / cnt
    # TODO(synk): switch to centered/Welford-style partials if E[x^2]-E[x]^2 cancellation
    #             ever becomes an issue at very large group sizes.
    var = jnp.maximum(sq / cnt - mean * mean, 0.0)
    inv = jax.lax.rsqrt(var + EPS)
    a = jnp.repeat(inv, cpg, axis=1) * gamma[None, :]            # (N, C)
    b = beta[None, :] - jnp.repeat(mean, cpg, axis=1) * a
    return a, b


# ---------------------------------------------------------------------------
# Kernel 2: fused  z = y*a + b -> SiLU -> (+time-emb bias) -> (+residual)
#           (the 1x1 res_conv is computed inside this epilogue from padded x)
# ---------------------------------------------------------------------------
def _gn_silu_epilogue(y, scale, shift, dims, *, channel_bias=None,
                      res_x=None, res_w=None, res_b=None, out_dtype=None):
    n, d, c, L = y.shape
    _, h, w = dims
    wp = w + 2
    has_cb = channel_bias is not None
    res_mode = None if res_x is None else ("conv" if res_w is not None else "identity")

    def kernel(*refs):
        i = 0
        y_ref = refs[i]; i += 1
        a_ref = refs[i]; i += 1
        b_ref = refs[i]; i += 1
        cb_ref = None
        if has_cb:
            cb_ref = refs[i]; i += 1
        xr_ref = wr_ref = br_ref = None
        if res_mode is not None:
            xr_ref = refs[i]; i += 1
            if res_mode == "conv":
                wr_ref = refs[i]; i += 1
                br_ref = refs[i]; i += 1
        o_ref = refs[i]

        z = y_ref[0, 0].astype(jnp.float32) * a_ref[0] + b_ref[0]     # folded GroupNorm
        z = z * jax.nn.sigmoid(z)                                     # SiLU
        if has_cb:
            z = z + cb_ref[0]                                         # time-emb bias (C, 1)
        if res_mode is not None:
            # conv-output lane p == padded-plane lane p + Wp + 1 at padded depth d+1
            xr = xr_ref[0, 0][:, wp + 1:wp + 1 + L]
            if res_mode == "conv":
                z = z + (jnp.dot(wr_ref[...], xr,
                                 preferred_element_type=jnp.float32) + br_ref[...])
            else:
                z = z + xr.astype(jnp.float32)
        o_ref[0, 0] = z.astype(o_ref.dtype)

    in_specs = [
        pl.BlockSpec((1, 1, c, L), lambda gi, gj: (gi, gj, 0, 0)),
        pl.BlockSpec((1, c, 1), lambda gi, gj: (gi, 0, 0)),
        pl.BlockSpec((1, c, 1), lambda gi, gj: (gi, 0, 0)),
    ]
    args = [y, scale, shift]
    if has_cb:
        in_specs.append(pl.BlockSpec((1, c, 1), lambda gi, gj: (gi, 0, 0)))
        args.append(channel_bias)
    if res_mode is not None:
        cr, hpwp = res_x.shape[2], res_x.shape[3]
        in_specs.append(pl.BlockSpec((1, 1, cr, hpwp), lambda gi, gj: (gi, gj + 1, 0, 0)))
        args.append(res_x)
        if res_mode == "conv":
            in_specs.append(pl.BlockSpec((c, cr), lambda gi, gj: (0, 0)))
            in_specs.append(pl.BlockSpec((c, 1), lambda gi, gj: (0, 0)))
            args.extend([res_w, res_b])

    out_dtype = out_dtype or y.dtype
    return pl.pallas_call(
        kernel,
        grid=(n, d),
        in_specs=in_specs,
        out_specs=pl.BlockSpec((1, 1, c, L), lambda gi, gj: (gi, gj, 0, 0)),
        out_shape=jax.ShapeDtypeStruct((n, d, c, L), out_dtype),
        compiler_params=pltpu.CompilerParams(
            dimension_semantics=("parallel", "parallel"),
            vmem_limit_bytes=_vmem_limit_bytes()),
    )(*args)


# ---------------------------------------------------------------------------
# XLA layout glue (pure data movement)
# ---------------------------------------------------------------------------
def _pad_to_conv_layout(x, compute_dtype):
    """(N, C, D, H, W) -> (N, D+2, C, (H+2)*(W+2)) zero-padded by 1 in D/H/W."""
    n, c, d, h, w = x.shape
    xt = jnp.transpose(x, (0, 2, 1, 3, 4)).astype(compute_dtype)
    xp = jnp.pad(xt, ((0, 0), (1, 1), (0, 0), (1, 1), (1, 1)))
    return xp.reshape(n, d + 2, c, (h + 2) * (w + 2))


def _flat_to_conv_layout(y, dims, compute_dtype):
    """(N, D, C, L) epilogue output -> (N, D+2, C, (H+2)*(W+2)) for the next conv."""
    n, _, c, L = y.shape
    d, h, w = dims
    wp = w + 2
    yv = jnp.pad(y, ((0, 0), (0, 0), (0, 0), (0, h * wp - L)))
    yv = yv.reshape(n, d, c, h, wp)[..., :w]                     # valid (N, D, C, H, W)
    yp = jnp.pad(yv.astype(compute_dtype),
                 ((0, 0), (1, 1), (0, 0), (1, 1), (1, 1)))
    return yp.reshape(n, d + 2, c, (h + 2) * (w + 2))


def _flat_to_ncdhw(y, dims, out_dtype):
    """(N, D, C, L) -> (N, C, D, H, W)."""
    n, _, c, L = y.shape
    d, h, w = dims
    wp = w + 2
    yv = jnp.pad(y, ((0, 0), (0, 0), (0, 0), (0, h * wp - L)))
    yv = yv.reshape(n, d, c, h, wp)[..., :w]
    return jnp.transpose(yv, (0, 2, 1, 3, 4)).astype(out_dtype)


# ---------------------------------------------------------------------------
# Modules
# ---------------------------------------------------------------------------
class Block:
    """Conv3d(3, pad=1) -> GroupNorm(groups) -> SiLU, with fused bias/residual epilogue."""

    def __init__(self, dim, dim_out, groups=8, *, key, compute_dtype=jnp.bfloat16):
        assert dim_out % groups == 0
        kw_, kb_, kg_, kbe_ = jax.random.split(key, 4)
        fan_in = dim * 27
        self.w = jax.random.normal(kw_, (dim_out, dim, 3, 3, 3), jnp.float32) / jnp.sqrt(fan_in)
        self.b = jax.random.normal(kb_, (dim_out,), jnp.float32) * 0.01
        self.gamma = 1.0 + 0.1 * jax.random.normal(kg_, (dim_out,), jnp.float32)
        self.beta = 0.1 * jax.random.normal(kbe_, (dim_out,), jnp.float32)
        self.dim, self.dim_out, self.groups = dim, dim_out, groups
        self.compute_dtype = compute_dtype
        # Kernel-side weight layout (kd, Cout, (kh*3+kw)*Cin + ci); bf16 MXU operands.
        self.w_taps = (jnp.transpose(self.w, (2, 0, 3, 4, 1))
                       .reshape(3, dim_out, 9 * dim).astype(compute_dtype))
        self.b2d = self.b.reshape(dim_out, 1).astype(jnp.float32)

    def __call__(self, x_pad, dims, *, channel_bias=None, res_x=None, res_w=None,
                 res_b=None, out_dtype=jnp.float32):
        d, h, w = dims
        # Conv + fused per-tile GroupNorm partial stats (f32 accumulation & f32 conv output).
        y, stats = _conv3d_gn_stats(x_pad, self.w_taps, self.b2d, dims, jnp.float32)
        scale, shift = _gn_scale_shift(stats, self.gamma, self.beta, self.groups, d * h * w)
        cb = channel_bias[:, :, None].astype(jnp.float32) if channel_bias is not None else None
        return _gn_silu_epilogue(y, scale[:, :, None], shift[:, :, None], dims,
                                 channel_bias=cb, res_x=res_x, res_w=res_w, res_b=res_b,
                                 out_dtype=out_dtype)


class ResnetBlock:
    """JAX/Pallas equivalent of the PyTorch ResnetBlock forward."""

    def __init__(self, dim, dim_out, *, time_emb_dim=None, groups=8, key,
                 compute_dtype=jnp.bfloat16):
        keys = jax.random.split(key, 4)
        self.block1 = Block(dim, dim_out, groups, key=keys[0], compute_dtype=compute_dtype)
        self.block2 = Block(dim_out, dim_out, groups, key=keys[1], compute_dtype=compute_dtype)
        self.dim, self.dim_out = dim, dim_out
        self.time_emb_dim = time_emb_dim
        self.compute_dtype = compute_dtype

        if time_emb_dim is not None:
            k1, k2 = jax.random.split(keys[2])
            self.mlp_w = jax.random.normal(k1, (dim_out, time_emb_dim), jnp.float32) / jnp.sqrt(time_emb_dim)
            self.mlp_b = jax.random.normal(k2, (dim_out,), jnp.float32) * 0.01
        else:
            self.mlp_w = None

        if dim != dim_out:
            k1, k2 = jax.random.split(keys[3])
            self.res_w = jax.random.normal(k1, (dim_out, dim), jnp.float32) / jnp.sqrt(dim)
            self.res_b = jax.random.normal(k2, (dim_out,), jnp.float32) * 0.01
            self.res_w_c = self.res_w.astype(compute_dtype)
            self.res_b2d = self.res_b.reshape(dim_out, 1).astype(jnp.float32)
        else:
            self.res_w = None

    def __call__(self, x, time_emb=None):
        n, c, d, h, w = x.shape
        dims = (d, h, w)

        # time-embedding MLP (SiLU -> Linear): tiny (N, T) x (T, C); plain JAX.
        cbias = None
        if self.mlp_w is not None and time_emb is not None:
            cbias = jax.nn.silu(time_emb) @ self.mlp_w.T + self.mlp_b       # (N, dim_out)

        x_pad = _pad_to_conv_layout(x, self.compute_dtype)                  # (N, D+2, Cin, HpWp)

        # block1: conv + GN + SiLU, time-emb bias fused after SiLU.
        h1 = self.block1(x_pad, dims, channel_bias=cbias, out_dtype=jnp.float32)
        h1_pad = _flat_to_conv_layout(h1, dims, self.compute_dtype)

        # block2: conv + GN + SiLU with the 1x1 res_conv / identity residual fused in-epilogue.
        if self.res_w is not None:
            out = self.block2(h1_pad, dims, res_x=x_pad, res_w=self.res_w_c,
                              res_b=self.res_b2d, out_dtype=x.dtype)
        else:
            out = self.block2(h1_pad, dims, res_x=x_pad, out_dtype=x.dtype)

        return _flat_to_ncdhw(out, dims, x.dtype)


# ---------------------------------------------------------------------------
# Pure-JAX f32 reference for correctness checking
# ---------------------------------------------------------------------------
def _conv3d_ref(x, w, b, pad):
    y = jax.lax.conv_general_dilated(
        x, w, (1, 1, 1), [(pad, pad)] * 3,
        dimension_numbers=('NCDHW', 'OIDHW', 'NCDHW'),
        precision=jax.lax.Precision.HIGHEST)
    return y + b[None, :, None, None, None]


def _block_ref(blk, x, channel_bias=None, residual=None):
    y = _conv3d_ref(x, blk.w, blk.b, 1)
    n = y.shape[0]
    yg = y.reshape(n, blk.groups, -1).astype(jnp.float32)
    mean = yg.mean(-1, keepdims=True)
    var = yg.var(-1, keepdims=True)
    yn = ((yg - mean) * jax.lax.rsqrt(var + EPS)).reshape(y.shape)
    yn = yn * blk.gamma[None, :, None, None, None] + blk.beta[None, :, None, None, None]
    out = jax.nn.silu(yn)
    if channel_bias is not None:
        out = out + channel_bias[:, :, None, None, None]
    if residual is not None:
        out = out + residual
    return out


def _resnet_block_ref(m, x, time_emb):
    cbias = None
    if m.mlp_w is not None and time_emb is not None:
        cbias = jax.nn.silu(time_emb) @ m.mlp_w.T + m.mlp_b
    h = _block_ref(m.block1, x, channel_bias=cbias)
    if m.res_w is not None:
        res = _conv3d_ref(x, m.res_w[:, :, None, None, None], m.res_b, 0)
    else:
        res = x
    return _block_ref(m.block2, h, residual=res)


if __name__ == "__main__":
    key = jax.random.PRNGKey(0)
    kx, kt, km = jax.random.split(key, 3)

    N, dim, dim_out, groups, T = 2, 4, 16, 8, 8
    D = H = W = 8

    x = jax.random.normal(kx, (N, dim, D, H, W), jnp.float32)
    time_emb = jax.random.normal(kt, (N, T), jnp.float32)

    module = ResnetBlock(dim, dim_out, time_emb_dim=T, groups=groups, key=km)

    fwd = jax.jit(lambda a, b: module(a, b))
    out = jax.block_until_ready(fwd(x, time_emb))
    ref = jax.block_until_ready(_resnet_block_ref(module, x, time_emb))

    assert out.shape == (N, dim_out, D, H, W), out.shape
    err = jnp.abs(out - ref)
    max_err = float(jnp.max(err))
    mean_err = float(jnp.mean(err))
    # bf16 MXU operands (f32 accumulation) across two 3x3x3 convs + GroupNorm -> loose tolerance.
    assert mean_err < 1e-2, (max_err, mean_err)
    assert bool(jnp.allclose(out, ref, rtol=5e-2, atol=5e-2)), (max_err, mean_err)

    print("KERNEL_OK")
</pallas_src>

<mosaic_0001>
module attributes {stable_mosaic.version = 11 : i64} {
  func.func @kernel(%arg0: i32, %arg1: i32, %arg2: memref<1x1x4x100xbf16, #tpu.memory_space<vmem>>, %arg3: memref<1x1x4x100xbf16, #tpu.memory_space<vmem>>, %arg4: memref<1x1x4x100xbf16, #tpu.memory_space<vmem>>, %arg5: memref<3x16x36xbf16, #tpu.memory_space<vmem>>, %arg6: memref<16x1xf32, #tpu.memory_space<vmem>>, %arg7: memref<1x1x16x78xf32, #tpu.memory_space<vmem>>, %arg8: memref<1x1x16x2xf32, #tpu.memory_space<vmem>>) attributes {dimension_semantics = [#tpu.dimension_semantics<parallel>, #tpu.dimension_semantics<parallel>], iteration_bounds = array<i64: 2, 8>, scalar_prefetch = 0 : i64, scratch_operands = 0 : i64, tpu.core_type = #tpu.core_type<tc>, window_params = [{transform_indices = @transform_0, window_bounds = array<i64: 1, 1, 4, 100>}, {transform_indices = @transform_1, window_bounds = array<i64: 1, 1, 4, 100>}, {transform_indices = @transform_2, window_bounds = array<i64: 1, 1, 4, 100>}, {pipeline_mode = #tpu.pipeline_mode<synchronous>, transform_indices = @transform_3, window_bounds = array<i64: 3, 16, 36>}, {pipeline_mode = #tpu.pipeline_mode<synchronous>, transform_indices = @transform_4, window_bounds = array<i64: 16, 1>}, {transform_indices = @transform_5, window_bounds = array<i64: 1, 1, 16, 78>}, {transform_indices = @transform_6, window_bounds = array<i64: 1, 1, 16, 2>}]} {
    %cst = arith.constant 0.000000e+00 : f32
    %0 = vector.broadcast %cst : f32 to vector<16x78xf32>
    %c0 = arith.constant 0 : index
    %c0_0 = arith.constant 0 : index
    %c0_1 = arith.constant 0 : index
    %c0_2 = arith.constant 0 : index
    %1 = vector.load %arg2[%c0, %c0_0, %c0_1, %c0_2] : memref<1x1x4x100xbf16, #tpu.memory_space<vmem>>, vector<1x1x4x100xbf16>
    %2 = vector.shape_cast %1 : vector<1x1x4x100xbf16> to vector<4x100xbf16>
    %3 = vector.extract_strided_slice %2 {offsets = [0, 0], sizes = [4, 78], strides = [1, 1]} : vector<4x100xbf16> to vector<4x78xbf16>
    %4 = vector.extract_strided_slice %2 {offsets = [0, 1], sizes = [4, 78], strides = [1, 1]} : vector<4x100xbf16> to vector<4x78xbf16>
    %5 = vector.extract_strided_slice %2 {offsets = [0, 2], sizes = [4, 78], strides = [1, 1]} : vector<4x100xbf16> to vector<4x78xbf16>
    %6 = vector.extract_strided_slice %2 {offsets = [0, 10], sizes = [4, 78], strides = [1, 1]} : vector<4x100xbf16> to vector<4x78xbf16>
    %7 = vector.extract_strided_slice %2 {offsets = [0, 11], sizes = [4, 78], strides = [1, 1]} : vector<4x100xbf16> to vector<4x78xbf16>
    %8 = vector.extract_strided_slice %2 {offsets = [0, 12], sizes = [4, 78], strides = [1, 1]} : vector<4x100xbf16> to vector<4x78xbf16>
    %9 = vector.extract_strided_slice %2 {offsets = [0, 20], sizes = [4, 78], strides = [1, 1]} : vector<4x100xbf16> to vector<4x78xbf16>
    %10 = vector.extract_strided_slice %2 {offsets = [0, 21], sizes = [4, 78], strides = [1, 1]} : vector<4x100xbf16> to vector<4x78xbf16>
    %11 = vector.extract_strided_slice %2 {offsets = [0, 22], sizes = [4, 78], strides = [1, 1]} : vector<4x100xbf16> to vector<4x78xbf16>
    %12 = tpu.concatenate %3, %4, %5, %6, %7, %8, %9, %10, %11 in 0 : vector<4x78xbf16>, vector<4x78xbf16>, vector<4x78xbf16>, vector<4x78xbf16>, vector<4x78xbf16>, vector<4x78xbf16>, vector<4x78xbf16>, vector<4x78xbf16>, vector<4x78xbf16> -> vector<36x78xbf16>
    %c0_3 = arith.constant 0 : index
    %c0_4 = arith.constant 0 : index
    %c0_5 = arith.constant 0 : index
    %13 = vector.load %arg5[%c0_3, %c0_4, %c0_5] : memref<3x16x36xbf16, #tpu.memory_space<vmem>>, vector<1x16x36xbf16>
    %14 = vector.shape_cast %13 : vector<1x16x36xbf16> to vector<16x36xbf16>
    %cst_6 = arith.constant dense<0.000000e+00> : vector<16x78xf32>
    %15 = tpu.matmul %14, %12, %cst_6 {dimension_numbers = #tpu.dot_dimension_numbers<[1], [0], [0], [1], [0, 0, 1, 1], [], []>} : vector<16x36xbf16>, vector<36x78xbf16>, vector<16x78xf32> -> vector<16x78xf32>
    %16 = arith.addf %0, %15 : vector<16x78xf32>
    %c0_7 = arith.constant 0 : index
    %c0_8 = arith.constant 0 : index
    %c0_9 = arith.constant 0 : index
    %c0_10 = arith.constant 0 : index
    %17 = vector.load %arg3[%c0_7, %c0_8, %c0_9, %c0_10] : memref<1x1x4x100xbf16, #tpu.memory_space<vmem>>, vector<1x1x4x100xbf16>
    %18 = vector.shape_cast %17 : vector<1x1x4x100xbf16> to vector<4x100xbf16>
    %19 = vector.extract_strided_slice %18 {offsets = [0, 0], sizes = [4, 78], strides = [1, 1]} : vector<4x100xbf16> to vector<4x78xbf16>
    %20 = vector.extract_strided_slice %18 {offsets = [0, 1], sizes = [4, 78], strides = [1, 1]} : vector<4x100xbf16> to vector<4x78xbf16>
    %21 = vector.extract_strided_slice %18 {offsets = [0, 2], sizes = [4, 78], strides = [1, 1]} : vector<4x100xbf16> to vector<4x78xbf16>
    %22 = vector.extract_strided_slice %18 {offsets = [0, 10], sizes = [4, 78], strides = [1, 1]} : vector<4x100xbf16> to vector<4x78xbf16>
    %23 = vector.extract_strided_slice %18 {offsets = [0, 11], sizes = [4, 78], strides = [1, 1]} : vector<4x100xbf16> to vector<4x78xbf16>
    %24 = vector.extract_strided_slice %18 {offsets = [0, 12], sizes = [4, 78], strides = [1, 1]} : vector<4x100xbf16> to vector<4x78xbf16>
    %25 = vector.extract_strided_slice %18 {offsets = [0, 20], sizes = [4, 78], strides = [1, 1]} : vector<4x100xbf16> to vector<4x78xbf16>
    %26 = vector.extract_strided_slice %18 {offsets = [0, 21], sizes = [4, 78], strides = [1, 1]} : vector<4x100xbf16> to vector<4x78xbf16>
    %27 = vector.extract_strided_slice %18 {offsets = [0, 22], sizes = [4, 78], strides = [1, 1]} : vector<4x100xbf16> to vector<4x78xbf16>
    %28 = tpu.concatenate %19, %20, %21, %22, %23, %24, %25, %26, %27 in 0 : vector<4x78xbf16>, vector<4x78xbf16>, vector<4x78xbf16>, vector<4x78xbf16>, vector<4x78xbf16>, vector<4x78xbf16>, vector<4x78xbf16>, vector<4x78xbf16>, vector<4x78xbf16> -> vector<36x78xbf16>
    %c1 = arith.constant 1 : index
    %c0_11 = arith.constant 0 : index
    %c0_12 = arith.constant 0 : index
    %29 = vector.load %arg5[%c1, %c0_11, %c0_12] : memref<3x16x36xbf16, #tpu.memory_space<vmem>>, vector<1x16x36xbf16>
    %30 = vector.shape_cast %29 : vector<1x16x36xbf16> to vector<16x36xbf16>
    %cst_13 = arith.constant dense<0.000000e+00> : vector<16x78xf32>
    %31 = tpu.matmul %30, %28, %cst_13 {dimension_numbers = #tpu.dot_dimension_numbers<[1], [0], [0], [1], [0, 0, 1, 1], [], []>} : vector<16x36xbf16>, vector<36x78xbf16>, vector<16x78xf32> -> vector<16x78xf32>
    %32 = arith.addf %16, %31 : vector<16x78xf32>
    %c0_14 = arith.constant 0 : index
    %c0_15 = arith.constant 0 : index
    %c0_16 = arith.constant 0 : index
    %c0_17 = arith.constant 0 : index
    %33 = vector.load %arg4[%c0_14, %c0_15, %c0_16, %c0_17] : memref<1x1x4x100xbf16, #tpu.memory_space<vmem>>, vector<1x1x4x100xbf16>
    %34 = vector.shape_cast %33 : vector<1x1x4x100xbf16> to vector<4x100xbf16>
    %35 = vector.extract_strided_slice %34 {offsets = [0, 0], sizes = [4, 78], strides = [1, 1]} : vector<4x100xbf16> to vector<4x78xbf16>
    %36 = vector.extract_strided_slice %34 {offsets = [0, 1], sizes = [4, 78], strides = [1, 1]} : vector<4x100xbf16> to vector<4x78xbf16>
    %37 = vector.extract_strided_slice %34 {offsets = [0, 2], sizes = [4, 78], strides = [1, 1]} : vector<4x100xbf16> to vector<4x78xbf16>
    %38 = vector.extract_strided_slice %34 {offsets = [0, 10], sizes = [4, 78], strides = [1, 1]} : vector<4x100xbf16> to vector<4x78xbf16>
    %39 = vector.extract_strided_slice %34 {offsets = [0, 11], sizes = [4, 78], strides = [1, 1]} : vector<4x100xbf16> to vector<4x78xbf16>
    %40 = vector.extract_strided_slice %34 {offsets = [0, 12], sizes = [4, 78], strides = [1, 1]} : vector<4x100xbf16> to vector<4x78xbf16>
    %41 = vector.extract_strided_slice %34 {offsets = [0, 20], sizes = [4, 78], strides = [1, 1]} : vector<4x100xbf16> to vector<4x78xbf16>
    %42 = vector.extract_strided_slice %34 {offsets = [0, 21], sizes = [4, 78], strides = [1, 1]} : vector<4x100xbf16> to vector<4x78xbf16>
    %43 = vector.extract_strided_slice %34 {offsets = [0, 22], sizes = [4, 78], strides = [1, 1]} : vector<4x100xbf16> to vector<4x78xbf16>
    %44 = tpu.concatenate %35, %36, %37, %38, %39, %40, %41, %42, %43 in 0 : vector<4x78xbf16>, vector<4x78xbf16>, vector<4x78xbf16>, vector<4x78xbf16>, vector<4x78xbf16>, vector<4x78xbf16>, vector<4x78xbf16>, vector<4x78xbf16>, vector<4x78xbf16> -> vector<36x78xbf16>
    %c2 = arith.constant 2 : index
    %c0_18 = arith.constant 0 : index
    %c0_19 = arith.constant 0 : index
    %45 = vector.load %arg5[%c2, %c0_18, %c0_19] : memref<3x16x36xbf16, #tpu.memory_space<vmem>>, vector<1x16x36xbf16>
    %46 = vector.shape_cast %45 : vector<1x16x36xbf16> to vector<16x36xbf16>
    %cst_20 = arith.constant dense<0.000000e+00> : vector<16x78xf32>
    %47 = tpu.matmul %46, %44, %cst_20 {dimension_numbers = #tpu.dot_dimension_numbers<[1], [0], [0], [1], [0, 0, 1, 1], [], []>} : vector<16x36xbf16>, vector<36x78xbf16>, vector<16x78xf32> -> vector<16x78xf32>
    %48 = arith.addf %32, %47 : vector<16x78xf32>
    %c0_21 = arith.constant 0 : index
    %c0_22 = arith.constant 0 : index
    %49 = vector.load %arg6[%c0_21, %c0_22] : memref<16x1xf32, #tpu.memory_space<vmem>>, vector<16x1xf32>
    %50 = vector.broadcast %49 : vector<16x1xf32> to vector<16x78xf32>
    %51 = arith.addf %48, %50 : vector<16x78xf32>
    %c0_23 = arith.constant 0 : index
    %c0_24 = arith.constant 0 : index
    %c0_25 = arith.constant 0 : index
    %c0_26 = arith.constant 0 : index
    %52 = vector.load %arg7[%c0_23, %c0_24, %c0_25, %c0_26] : memref<1x1x16x78xf32, #tpu.memory_space<vmem>>, vector<1x1x16x78xf32>
    %53 = vector.shape_cast %52 : vector<1x1x16x78xf32> to vector<16x78xf32>
    %54 = vector.shape_cast %51 : vector<16x78xf32> to vector<1x1x16x78xf32>
    tpu.vector_store %arg7[%c0_23, %c0_24, %c0_25, %c0_26], %54 {strides = array<i32>} : memref<1x1x16x78xf32, #tpu.memory_space<vmem>>, vector<1x1x16x78xf32>,
    %55 = tpu.iota {dimensions = array<i32: 1>} : vector<1x78xi32>
    %c10_i32 = arith.constant 10 : i32
    %c0_i32 = arith.constant 0 : i32
    %56 = arith.cmpi eq, %c10_i32, %c0_i32 : i32
    %c1_i32 = arith.constant 1 : i32
    %57 = arith.select %56, %c1_i32, %c10_i32 : i32
    %58 = vector.broadcast %57 : i32 to vector<1x78xi32>
    %59 = arith.remsi %55, %58 : vector<1x78xi32>
    %c0_i32_27 = arith.constant 0 : i32
    %60 = vector.broadcast %c0_i32_27 : i32 to vector<1x78xi32>
    %61 = arith.cmpi ne, %59, %60 : vector<1x78xi32>
    %c0_i32_28 = arith.constant 0 : i32
    %62 = vector.broadcast %c0_i32_28 : i32 to vector<1x78xi32>
    %63 = arith.cmpi slt, %59, %62 : vector<1x78xi32>
    %c0_i32_29 = arith.constant 0 : i32
    %64 = arith.cmpi slt, %57, %c0_i32_29 : i32
    %65 = vector.broadcast %64 : i1 to vector<1x78xi1>
    %66 = vector.broadcast %65 : vector<1x78xi1> to vector<1x78xi1>
    %67 = arith.xori %63, %66 : vector<1x78xi1>
    %68 = arith.andi %67, %61 : vector<1x78xi1>
    %69 = vector.broadcast %57 : i32 to vector<1x78xi32>
    %70 = arith.addi %59, %69 : vector<1x78xi32>
    %71 = arith.select %68, %70, %59 : vector<1x78xi1>, vector<1x78xi32>
    %c8_i32 = arith.constant 8 : i32
    %72 = vector.broadcast %c8_i32 : i32 to vector<1x78xi32>
    %73 = arith.cmpi slt, %71, %72 : vector<1x78xi32>
    %74 = arith.extui %73 : vector<1x78xi1> to vector<1x78xi32>
    %75 = arith.sitofp %74 : vector<1x78xi32> to vector<1x78xf32>
    %76 = vector.broadcast %75 : vector<1x78xf32> to vector<16x78xf32>
    %77 = arith.mulf %51, %76 : vector<16x78xf32>
    %cst_30 = arith.constant dense<0.000000e+00> : vector<16xf32>
    %78 = vector.multi_reduction <add>, %77, %cst_30 [1] : vector<16x78xf32> to vector<16xf32>
    %79 = vector.shape_cast %78 : vector<16xf32> to vector<16x1xf32>
    %80 = arith.mulf %77, %51 : vector<16x78xf32>
    %cst_31 = arith.constant dense<0.000000e+00> : vector<16xf32>
    %81 = vector.multi_reduction <add>, %80, %cst_31 [1] : vector<16x78xf32> to vector<16xf32>
    %82 = vector.shape_cast %81 : vector<16xf32> to vector<16x1xf32>
    %83 = tpu.concatenate %79, %82 in 1 : vector<16x1xf32>, vector<16x1xf32> -> vector<16x2xf32>
    %c0_32 = arith.constant 0 : index
    %c0_33 = arith.constant 0 : index
    %c0_34 = arith.constant 0 : index
    %c0_35 = arith.constant 0 : index
    %84 = vector.load %arg8[%c0_32, %c0_33, %c0_34, %c0_35] : memref<1x1x16x2xf32, #tpu.memory_space<vmem>>, vector<1x1x16x2xf32>
    %85 = vector.shape_cast %84 : vector<1x1x16x2xf32> to vector<16x2xf32>
    %86 = vector.shape_cast %83 : vector<16x2xf32> to vector<1x1x16x2xf32>
    tpu.vector_store %arg8[%c0_32, %c0_33, %c0_34, %c0_35], %86 {strides = array<i32>} : memref<1x1x16x2xf32, #tpu.memory_space<vmem>>, vector<1x1x16x2xf32>,
    return
  }
  func.func @transform_0(%arg0: i32, %arg1: i32) -> (i32, i32, i32, i32) {
    %c0_i32 = arith.constant 0 : i32
    %0 = arith.addi %arg1, %c0_i32 : i32
    %c0_i32_0 = arith.constant 0 : i32
    %c0_i32_1 = arith.constant 0 : i32
    %c0_i32_2 = arith.constant 0 : i32
    return %arg0, %0, %c0_i32_0, %c0_i32_1 : i32, i32, i32, i32
  }
  func.func @transform_1(%arg0: i32, %arg1: i32) -> (i32, i32, i32, i32) {
    %c1_i32 = arith.constant 1 : i32
    %0 = arith.addi %arg1, %c1_i32 : i32
    %c0_i32 = arith.constant 0 : i32
    %c0_i32_0 = arith.constant 0 : i32
    %c0_i32_1 = arith.constant 0 : i32
    return %arg0, %0, %c0_i32, %c0_i32_0 : i32, i32, i32, i32
  }
  func.func @transform_2(%arg0: i32, %arg1: i32) -> (i32, i32, i32, i32) {
    %c2_i32 = arith.constant 2 : i32
    %0 = arith.addi %arg1, %c2_i32 : i32
    %c0_i32 = arith.constant 0 : i32
    %c0_i32_0 = arith.constant 0 : i32
    %c0_i32_1 = arith.constant 0 : i32
    return %arg0, %0, %c0_i32, %c0_i32_0 : i32, i32, i32, i32
  }
  func.func @transform_3(%arg0: i32, %arg1: i32) -> (i32, i32, i32) {
    %c0_i32 = arith.constant 0 : i32
    %c0_i32_0 = arith.constant 0 : i32
    %c0_i32_1 = arith.constant 0 : i32
    %c0_i32_2 = arith.constant 0 : i32
    return %c0_i32, %c0_i32_0, %c0_i32_1 : i32, i32, i32
  }
  func.func @transform_4(%arg0: i32, %arg1: i32) -> (i32, i32) {
    %c0_i32 = arith.constant 0 : i32
    %c0_i32_0 = arith.constant 0 : i32
    %c0_i32_1 = arith.constant 0 : i32
    return %c0_i32, %c0_i32_0 : i32, i32
  }
  func.func @transform_5(%arg0: i32, %arg1: i32) -> (i32, i32, i32, i32) {
    %c0_i32 = arith.constant 0 : i32
    %c0_i32_0 = arith.constant 0 : i32
    %c0_i32_1 = arith.constant 0 : i32
    return %arg0, %arg1, %c0_i32, %c0_i32_0 : i32, i32, i32, i32
  }
  func.func @transform_6(%arg0: i32, %arg1: i32) -> (i32, i32, i32, i32) {
    %c0_i32 = arith.constant 0 : i32
    %c0_i32_0 = arith.constant 0 : i32
    %c0_i32_1 = arith.constant 0 : i32
    return %arg0, %arg1, %c0_i32, %c0_i32_0 : i32, i32, i32, i32
  }
}

module attributes {stable_mosaic.version = 11 : i64} {
  func.func @kernel(%arg0: i32, %arg1: i32, %arg2: memref<1x1x16x78xf32, #tpu.memory_space<vmem>>, %arg3: memref<1x16x1xf32, #tpu.memory_space<vmem>>, %arg4: memref<1x16x1xf32, #tpu.memory_space<vmem>>, %arg5: memref<1x16x1xf32, #tpu.memory_space<vmem>>, %arg6: memref<1x1x16x78xf32, #tpu.memory_space<vmem>>) attributes {dimension_semantics = [#tpu.dimension_semantics<parallel>, #tpu.dimension_semantics<parallel>], iteration_bounds = array<i64: 2, 8>, scalar_prefetch = 0 : i64, scratch_operands = 0 : i64, tpu.core_type = #tpu.core_type<tc>, window_params = [{transform_indices = @transform_0, window_bounds = array<i64: 1, 1, 16, 78>}, {transform_indices = @transform_1, window_bounds = array<i64: 1, 16, 1>}, {transform_indices = @transform_2, window_bounds = array<i64: 1, 16, 1>}, {transform_indices = @transform_3, window_bounds = array<i64: 1, 16, 1>}, {transform_indices = @transform_4, window_bounds = array<i64: 1, 1, 16, 78>}]} {
    %c0 = arith.constant 0 : index
    %c0_0 = arith.constant 0 : index
    %c0_1 = arith.constant 0 : index
    %c0_2 = arith.constant 0 : index
    %0 = vector.load %arg2[%c0, %c0_0, %c0_1, %c0_2] : memref<1x1x16x78xf32, #tpu.memory_space<vmem>>, vector<1x1x16x78xf32>
    %1 = vector.shape_cast %0 : vector<1x1x16x78xf32> to vector<16x78xf32>
    %c0_3 = arith.constant 0 : index
    %c0_4 = arith.constant 0 : index
    %c0_5 = arith.constant 0 : index
    %2 = vector.load %arg3[%c0_3, %c0_4, %c0_5] : memref<1x16x1xf32, #tpu.memory_space<vmem>>, vector<1x16x1xf32>
    %3 = vector.shape_cast %2 : vector<1x16x1xf32> to vector<16x1xf32>
    %4 = vector.broadcast %3 : vector<16x1xf32> to vector<16x78xf32>
    %5 = arith.mulf %1, %4 : vector<16x78xf32>
    %c0_6 = arith.constant 0 : index
    %c0_7 = arith.constant 0 : index
    %c0_8 = arith.constant 0 : index
    %6 = vector.load %arg4[%c0_6, %c0_7, %c0_8] : memref<1x16x1xf32, #tpu.memory_space<vmem>>, vector<1x16x1xf32>
    %7 = vector.shape_cast %6 : vector<1x16x1xf32> to vector<16x1xf32>
    %8 = vector.broadcast %7 : vector<16x1xf32> to vector<16x78xf32>
    %9 = arith.addf %5, %8 : vector<16x78xf32>
    %10 = arith.negf %9 : vector<16x78xf32>
    %11 = math.exp %10 : vector<16x78xf32>
    %cst = arith.constant 1.000000e+00 : f32
    %12 = vector.broadcast %cst : f32 to vector<16x78xf32>
    %13 = arith.addf %12, %11 : vector<16x78xf32>
    %14 = arith.divf %12, %13 : vector<16x78xf32>
    %15 = arith.mulf %9, %14 : vector<16x78xf32>
    %c0_9 = arith.constant 0 : index
    %c0_10 = arith.constant 0 : index
    %c0_11 = arith.constant 0 : index
    %16 = vector.load %arg5[%c0_9, %c0_10, %c0_11] : memref<1x16x1xf32, #tpu.memory_space<vmem>>, vector<1x16x1xf32>
    %17 = vector.shape_cast %16 : vector<1x16x1xf32> to vector<16x1xf32>
    %18 = vector.broadcast %17 : vector<16x1xf32> to vector<16x78xf32>
    %19 = arith.addf %15, %18 : vector<16x78xf32>
    %c0_12 = arith.constant 0 : index
    %c0_13 = arith.constant 0 : index
    %c0_14 = arith.constant 0 : index
    %c0_15 = arith.constant 0 : index
    %20 = vector.load %arg6[%c0_12, %c0_13, %c0_14, %c0_15] : memref<1x1x16x78xf32, #tpu.memory_space<vmem>>, vector<1x1x16x78xf32>
    %21 = vector.shape_cast %20 : vector<1x1x16x78xf32> to vector<16x78xf32>
    %22 = vector.shape_cast %19 : vector<16x78xf32> to vector<1x1x16x78xf32>
    tpu.vector_store %arg6[%c0_12, %c0_13, %c0_14, %c0_15], %22 {strides = array<i32>} : memref<1x1x16x78xf32, #tpu.memory_space<vmem>>, vector<1x1x16x78xf32>,
    return
  }
  func.func @transform_0(%arg0: i32, %arg1: i32) -> (i32, i32, i32, i32) {
    %c0_i32 = arith.constant 0 : i32
    %c0_i32_0 = arith.constant 0 : i32
    %c0_i32_1 = arith.constant 0 : i32
    return %arg0, %arg1, %c0_i32, %c0_i32_0 : i32, i32, i32, i32
  }
  func.func @transform_1(%arg0: i32, %arg1: i32) -> (i32, i32, i32) {
    %c0_i32 = arith.constant 0 : i32
    %c0_i32_0 = arith.constant 0 : i32
    %c0_i32_1 = arith.constant 0 : i32
    return %arg0, %c0_i32, %c0_i32_0 : i32, i32, i32
  }
  func.func @transform_2(%arg0: i32, %arg1: i32) -> (i32, i32, i32) {
    %c0_i32 = arith.constant 0 : i32
    %c0_i32_0 = arith.constant 0 : i32
    %c0_i32_1 = arith.constant 0 : i32
    return %arg0, %c0_i32, %c0_i32_0 : i32, i32, i32
  }
  func.func @transform_3(%arg0: i32, %arg1: i32) -> (i32, i32, i32) {
    %c0_i32 = arith.constant 0 : i32
    %c0_i32_0 = arith.constant 0 : i32
    %c0_i32_1 = arith.constant 0 : i32
    return %arg0, %c0_i32, %c0_i32_0 : i32, i32, i32
  }
  func.func @transform_4(%arg0: i32, %arg1: i32) -> (i32, i32, i32, i32) {
    %c0_i32 = arith.constant 0 : i32
    %c0_i32_0 = arith.constant 0 : i32
    %c0_i32_1 = arith.constant 0 : i32
    return %arg0, %arg1, %c0_i32, %c0_i32_0 : i32, i32, i32, i32
  }
}

module attributes {stable_mosaic.version = 11 : i64} {
  func.func @kernel(%arg0: i32, %arg1: i32, %arg2: memref<1x1x16x100xbf16, #tpu.memory_space<vmem>>, %arg3: memref<1x1x16x100xbf16, #tpu.memory_space<vmem>>, %arg4: memref<1x1x16x100xbf16, #tpu.memory_space<vmem>>, %arg5: memref<3x16x144xbf16, #tpu.memory_space<vmem>>, %arg6: memref<16x1xf32, #tpu.memory_space<vmem>>, %arg7: memref<1x1x16x78xf32, #tpu.memory_space<vmem>>, %arg8: memref<1x1x16x2xf32, #tpu.memory_space<vmem>>) attributes {dimension_semantics = [#tpu.dimension_semantics<parallel>, #tpu.dimension_semantics<parallel>], iteration_bounds = array<i64: 2, 8>, scalar_prefetch = 0 : i64, scratch_operands = 0 : i64, tpu.core_type = #tpu.core_type<tc>, window_params = [{transform_indices = @transform_0, window_bounds = array<i64: 1, 1, 16, 100>}, {transform_indices = @transform_1, window_bounds = array<i64: 1, 1, 16, 100>}, {transform_indices = @transform_2, window_bounds = array<i64: 1, 1, 16, 100>}, {pipeline_mode = #tpu.pipeline_mode<synchronous>, transform_indices = @transform_3, window_bounds = array<i64: 3, 16, 144>}, {pipeline_mode = #tpu.pipeline_mode<synchronous>, transform_indices = @transform_4, window_bounds = array<i64: 16, 1>}, {transform_indices = @transform_5, window_bounds = array<i64: 1, 1, 16, 78>}, {transform_indices = @transform_6, window_bounds = array<i64: 1, 1, 16, 2>}]} {
    %cst = arith.constant 0.000000e+00 : f32
    %0 = vector.broadcast %cst : f32 to vector<16x78xf32>
    %c0 = arith.constant 0 : index
    %c0_0 = arith.constant 0 : index
    %c0_1 = arith.constant 0 : index
    %c0_2 = arith.constant 0 : index
    %1 = vector.load %arg2[%c0, %c0_0, %c0_1, %c0_2] : memref<1x1x16x100xbf16, #tpu.memory_space<vmem>>, vector<1x1x16x100xbf16>
    %2 = vector.shape_cast %1 : vector<1x1x16x100xbf16> to vector<16x100xbf16>
    %3 = vector.extract_strided_slice %2 {offsets = [0, 0], sizes = [16, 78], strides = [1, 1]} : vector<16x100xbf16> to vector<16x78xbf16>
    %4 = vector.extract_strided_slice %2 {offsets = [0, 1], sizes = [16, 78], strides = [1, 1]} : vector<16x100xbf16> to vector<16x78xbf16>
    %5 = vector.extract_strided_slice %2 {offsets = [0, 2], sizes = [16, 78], strides = [1, 1]} : vector<16x100xbf16> to vector<16x78xbf16>
    %6 = vector.extract_strided_slice %2 {offsets = [0, 10], sizes = [16, 78], strides = [1, 1]} : vector<16x100xbf16> to vector<16x78xbf16>
    %7 = vector.extract_strided_slice %2 {offsets = [0, 11], sizes = [16, 78], strides = [1, 1]} : vector<16x100xbf16> to vector<16x78xbf16>
    %8 = vector.extract_strided_slice %2 {offsets = [0, 12], sizes = [16, 78], strides = [1, 1]} : vector<16x100xbf16> to vector<16x78xbf16>
    %9 = vector.extract_strided_slice %2 {offsets = [0, 20], sizes = [16, 78], strides = [1, 1]} : vector<16x100xbf16> to vector<16x78xbf16>
    %10 = vector.extract_strided_slice %2 {offsets = [0, 21], sizes = [16, 78], strides = [1, 1]} : vector<16x100xbf16> to vector<16x78xbf16>
    %11 = vector.extract_strided_slice %2 {offsets = [0, 22], sizes = [16, 78], strides = [1, 1]} : vector<16x100xbf16> to vector<16x78xbf16>
    %12 = tpu.concatenate %3, %4, %5, %6, %7, %8, %9, %10, %11 in 0 : vector<16x78xbf16>, vector<16x78xbf16>, vector<16x78xbf16>, vector<16x78xbf16>, vector<16x78xbf16>, vector<16x78xbf16>, vector<16x78xbf16>, vector<16x78xbf16>, vector<16x78xbf16> -> vector<144x78xbf16>
    %c0_3 = arith.constant 0 : index
    %c0_4 = arith.constant 0 : index
    %c0_5 = arith.constant 0 : index
    %13 = vector.load %arg5[%c0_3, %c0_4, %c0_5] : memref<3x16x144xbf16, #tpu.memory_space<vmem>>, vector<1x16x144xbf16>
    %14 = vector.shape_cast %13 : vector<1x16x144xbf16> to vector<16x144xbf16>
    %cst_6 = arith.constant dense<0.000000e+00> : vector<16x78xf32>
    %15 = tpu.matmul %14, %12, %cst_6 {dimension_numbers = #tpu.dot_dimension_numbers<[1], [0], [0], [1], [0, 0, 1, 1], [], []>} : vector<16x144xbf16>, vector<144x78xbf16>, vector<16x78xf32> -> vector<16x78xf32>
    %16 = arith.addf %0, %15 : vector<16x78xf32>
    %c0_7 = arith.constant 0 : index
    %c0_8 = arith.constant 0 : index
    %c0_9 = arith.constant 0 : index
    %c0_10 = arith.constant 0 : index
    %17 = vector.load %arg3[%c0_7, %c0_8, %c0_9, %c0_10] : memref<1x1x16x100xbf16, #tpu.memory_space<vmem>>, vector<1x1x16x100xbf16>
    %18 = vector.shape_cast %17 : vector<1x1x16x100xbf16> to vector<16x100xbf16>
    %19 = vector.extract_strided_slice %18 {offsets = [0, 0], sizes = [16, 78], strides = [1, 1]} : vector<16x100xbf16> to vector<16x78xbf16>
    %20 = vector.extract_strided_slice %18 {offsets = [0, 1], sizes = [16, 78], strides = [1, 1]} : vector<16x100xbf16> to vector<16x78xbf16>
    %21 = vector.extract_strided_slice %18 {offsets = [0, 2], sizes = [16, 78], strides = [1, 1]} : vector<16x100xbf16> to vector<16x78xbf16>
    %22 = vector.extract_strided_slice %18 {offsets = [0, 10], sizes = [16, 78], strides = [1, 1]} : vector<16x100xbf16> to vector<16x78xbf16>
    %23 = vector.extract_strided_slice %18 {offsets = [0, 11], sizes = [16, 78], strides = [1, 1]} : vector<16x100xbf16> to vector<16x78xbf16>
    %24 = vector.extract_strided_slice %18 {offsets = [0, 12], sizes = [16, 78], strides = [1, 1]} : vector<16x100xbf16> to vector<16x78xbf16>
    %25 = vector.extract_strided_slice %18 {offsets = [0, 20], sizes = [16, 78], strides = [1, 1]} : vector<16x100xbf16> to vector<16x78xbf16>
    %26 = vector.extract_strided_slice %18 {offsets = [0, 21], sizes = [16, 78], strides = [1, 1]} : vector<16x100xbf16> to vector<16x78xbf16>
    %27 = vector.extract_strided_slice %18 {offsets = [0, 22], sizes = [16, 78], strides = [1, 1]} : vector<16x100xbf16> to vector<16x78xbf16>
    %28 = tpu.concatenate %19, %20, %21, %22, %23, %24, %25, %26, %27 in 0 : vector<16x78xbf16>, vector<16x78xbf16>, vector<16x78xbf16>, vector<16x78xbf16>, vector<16x78xbf16>, vector<16x78xbf16>, vector<16x78xbf16>, vector<16x78xbf16>, vector<16x78xbf16> -> vector<144x78xbf16>
    %c1 = arith.constant 1 : index
    %c0_11 = arith.constant 0 : index
    %c0_12 = arith.constant 0 : index
    %29 = vector.load %arg5[%c1, %c0_11, %c0_12] : memref<3x16x144xbf16, #tpu.memory_space<vmem>>, vector<1x16x144xbf16>
    %30 = vector.shape_cast %29 : vector<1x16x144xbf16> to vector<16x144xbf16>
    %cst_13 = arith.constant dense<0.000000e+00> : vector<16x78xf32>
    %31 = tpu.matmul %30, %28, %cst_13 {dimension_numbers = #tpu.dot_dimension_numbers<[1], [0], [0], [1], [0, 0, 1, 1], [], []>} : vector<16x144xbf16>, vector<144x78xbf16>, vector<16x78xf32> -> vector<16x78xf32>
    %32 = arith.addf %16, %31 : vector<16x78xf32>
    %c0_14 = arith.constant 0 : index
    %c0_15 = arith.constant 0 : index
    %c0_16 = arith.constant 0 : index
    %c0_17 = arith.constant 0 : index
    %33 = vector.load %arg4[%c0_14, %c0_15, %c0_16, %c0_17] : memref<1x1x16x100xbf16, #tpu.memory_space<vmem>>, vector<1x1x16x100xbf16>
    %34 = vector.shape_cast %33 : vector<1x1x16x100xbf16> to vector<16x100xbf16>
    %35 = vector.extract_strided_slice %34 {offsets = [0, 0], sizes = [16, 78], strides = [1, 1]} : vector<16x100xbf16> to vector<16x78xbf16>
    %36 = vector.extract_strided_slice %34 {offsets = [0, 1], sizes = [16, 78], strides = [1, 1]} : vector<16x100xbf16> to vector<16x78xbf16>
    %37 = vector.extract_strided_slice %34 {offsets = [0, 2], sizes = [16, 78], strides = [1, 1]} : vector<16x100xbf16> to vector<16x78xbf16>
    %38 = vector.extract_strided_slice %34 {offsets = [0, 10], sizes = [16, 78], strides = [1, 1]} : vector<16x100xbf16> to vector<16x78xbf16>
    %39 = vector.extract_strided_slice %34 {offsets = [0, 11], sizes = [16, 78], strides = [1, 1]} : vector<16x100xbf16> to vector<16x78xbf16>
    %40 = vector.extract_strided_slice %34 {offsets = [0, 12], sizes = [16, 78], strides = [1, 1]} : vector<16x100xbf16> to vector<16x78xbf16>
    %41 = vector.extract_strided_slice %34 {offsets = [0, 20], sizes = [16, 78], strides = [1, 1]} : vector<16x100xbf16> to vector<16x78xbf16>
    %42 = vector.extract_strided_slice %34 {offsets = [0, 21], sizes = [16, 78], strides = [1, 1]} : vector<16x100xbf16> to vector<16x78xbf16>
    %43 = vector.extract_strided_slice %34 {offsets = [0, 22], sizes = [16, 78], strides = [1, 1]} : vector<16x100xbf16> to vector<16x78xbf16>
    %44 = tpu.concatenate %35, %36, %37, %38, %39, %40, %41, %42, %43 in 0 : vector<16x78xbf16>, vector<16x78xbf16>, vector<16x78xbf16>, vector<16x78xbf16>, vector<16x78xbf16>, vector<16x78xbf16>, vector<16x78xbf16>, vector<16x78xbf16>, vector<16x78xbf16> -> vector<144x78xbf16>
    %c2 = arith.constant 2 : index
    %c0_18 = arith.constant 0 : index
    %c0_19 = arith.constant 0 : index
    %45 = vector.load %arg5[%c2, %c0_18, %c0_19] : memref<3x16x144xbf16, #tpu.memory_space<vmem>>, vector<1x16x144xbf16>
    %46 = vector.shape_cast %45 : vector<1x16x144xbf16> to vector<16x144xbf16>
    %cst_20 = arith.constant dense<0.000000e+00> : vector<16x78xf32>
    %47 = tpu.matmul %46, %44, %cst_20 {dimension_numbers = #tpu.dot_dimension_numbers<[1], [0], [0], [1], [0, 0, 1, 1], [], []>} : vector<16x144xbf16>, vector<144x78xbf16>, vector<16x78xf32> -> vector<16x78xf32>
    %48 = arith.addf %32, %47 : vector<16x78xf32>
    %c0_21 = arith.constant 0 : index
    %c0_22 = arith.constant 0 : index
    %49 = vector.load %arg6[%c0_21, %c0_22] : memref<16x1xf32, #tpu.memory_space<vmem>>, vector<16x1xf32>
    %50 = vector.broadcast %49 : vector<16x1xf32> to vector<16x78xf32>
    %51 = arith.addf %48, %50 : vector<16x78xf32>
    %c0_23 = arith.constant 0 : index
    %c0_24 = arith.constant 0 : index
    %c0_25 = arith.constant 0 : index
    %c0_26 = arith.constant 0 : index
    %52 = vector.load %arg7[%c0_23, %c0_24, %c0_25, %c0_26] : memref<1x1x16x78xf32, #tpu.memory_space<vmem>>, vector<1x1x16x78xf32>
    %53 = vector.shape_cast %52 : vector<1x1x16x78xf32> to vector<16x78xf32>
    %54 = vector.shape_cast %51 : vector<16x78xf32> to vector<1x1x16x78xf32>
    tpu.vector_store %arg7[%c0_23, %c0_24, %c0_25, %c0_26], %54 {strides = array<i32>} : memref<1x1x16x78xf32, #tpu.memory_space<vmem>>, vector<1x1x16x78xf32>,
    %55 = tpu.iota {dimensions = array<i32: 1>} : vector<1x78xi32>
    %c10_i32 = arith.constant 10 : i32
    %c0_i32 = arith.constant 0 : i32
    %56 = arith.cmpi eq, %c10_i32, %c0_i32 : i32
    %c1_i32 = arith.constant 1 : i32
    %57 = arith.select %56, %c1_i32, %c10_i32 : i32
    %58 = vector.broadcast %57 : i32 to vector<1x78xi32>
    %59 = arith.remsi %55, %58 : vector<1x78xi32>
    %c0_i32_27 = arith.constant 0 : i32
    %60 = vector.broadcast %c0_i32_27 : i32 to vector<1x78xi32>
    %61 = arith.cmpi ne, %59, %60 : vector<1x78xi32>
    %c0_i32_28 = arith.constant 0 : i32
    %62 = vector.broadcast %c0_i32_28 : i32 to vector<1x78xi32>
    %63 = arith.cmpi slt, %59, %62 : vector<1x78xi32>
    %c0_i32_29 = arith.constant 0 : i32
    %64 = arith.cmpi slt, %57, %c0_i32_29 : i32
    %65 = vector.broadcast %64 : i1 to vector<1x78xi1>
    %66 = vector.broadcast %65 : vector<1x78xi1> to vector<1x78xi1>
    %67 = arith.xori %63, %66 : vector<1x78xi1>
    %68 = arith.andi %67, %61 : vector<1x78xi1>
    %69 = vector.broadcast %57 : i32 to vector<1x78xi32>
    %70 = arith.addi %59, %69 : vector<1x78xi32>
    %71 = arith.select %68, %70, %59 : vector<1x78xi1>, vector<1x78xi32>
    %c8_i32 = arith.constant 8 : i32
    %72 = vector.broadcast %c8_i32 : i32 to vector<1x78xi32>
    %73 = arith.cmpi slt, %71, %72 : vector<1x78xi32>
    %74 = arith.extui %73 : vector<1x78xi1> to vector<1x78xi32>
    %75 = arith.sitofp %74 : vector<1x78xi32> to vector<1x78xf32>
    %76 = vector.broadcast %75 : vector<1x78xf32> to vector<16x78xf32>
    %77 = arith.mulf %51, %76 : vector<16x78xf32>
    %cst_30 = arith.constant dense<0.000000e+00> : vector<16xf32>
    %78 = vector.multi_reduction <add>, %77, %cst_30 [1] : vector<16x78xf32> to vector<16xf32>
    %79 = vector.shape_cast %78 : vector<16xf32> to vector<16x1xf32>
    %80 = arith.mulf %77, %51 : vector<16x78xf32>
    %cst_31 = arith.constant dense<0.000000e+00> : vector<16xf32>
    %81 = vector.multi_reduction <add>, %80, %cst_31 [1] : vector<16x78xf32> to vector<16xf32>
    %82 = vector.shape_cast %81 : vector<16xf32> to vector<16x1xf32>
    %83 = tpu.concatenate %79, %82 in 1 : vector<16x1xf32>, vector<16x1xf32> -> vector<16x2xf32>
    %c0_32 = arith.constant 0 : index
    %c0_33 = arith.constant 0 : index
    %c0_34 = arith.constant 0 : index
    %c0_35 = arith.constant 0 : index
    %84 = vector.load %arg8[%c0_32, %c0_33, %c0_34, %c0_35] : memref<1x1x16x2xf32, #tpu.memory_space<vmem>>, vector<1x1x16x2xf32>
    %85 = vector.shape_cast %84 : vector<1x1x16x2xf32> to vector<16x2xf32>
    %86 = vector.shape_cast %83 : vector<16x2xf32> to vector<1x1x16x2xf32>
    tpu.vector_store %arg8[%c0_32, %c0_33, %c0_34, %c0_35], %86 {strides = array<i32>} : memref<1x1x16x2xf32, #tpu.memory_space<vmem>>, vector<1x1x16x2xf32>,
    return
  }
  func.func @transform_0(%arg0: i32, %arg1: i32) -> (i32, i32, i32, i32) {
    %c0_i32 = arith.constant 0 : i32
    %0 = arith.addi %arg1, %c0_i32 : i32
    %c0_i32_0 = arith.constant 0 : i32
    %c0_i32_1 = arith.constant 0 : i32
    %c0_i32_2 = arith.constant 0 : i32
    return %arg0, %0, %c0_i32_0, %c0_i32_1 : i32, i32, i32, i32
  }
  func.func @transform_1(%arg0: i32, %arg1: i32) -> (i32, i32, i32, i32) {
    %c1_i32 = arith.constant 1 : i32
    %0 = arith.addi %arg1, %c1_i32 : i32
    %c0_i32 = arith.constant 0 : i32
    %c0_i32_0 = arith.constant 0 : i32
    %c0_i32_1 = arith.constant 0 : i32
    return %arg0, %0, %c0_i32, %c0_i32_0 : i32, i32, i32, i32
  }
  func.func @transform_2(%arg0: i32, %arg1: i32) -> (i32, i32, i32, i32) {
    %c2_i32 = arith.constant 2 : i32
    %0 = arith.addi %arg1, %c2_i32 : i32
    %c0_i32 = arith.constant 0 : i32
    %c0_i32_0 = arith.constant 0 : i32
    %c0_i32_1 = arith.constant 0 : i32
    return %arg0, %0, %c0_i32, %c0_i32_0 : i32, i32, i32, i32
  }
  func.func @transform_3(%arg0: i32, %arg1: i32) -> (i32, i32, i32) {
    %c0_i32 = arith.constant 0 : i32
    %c0_i32_0 = arith.constant 0 : i32
    %c0_i32_1 = arith.constant 0 : i32
    %c0_i32_2 = arith.constant 0 : i32
    return %c0_i32, %c0_i32_0, %c0_i32_1 : i32, i32, i32
  }
  func.func @transform_4(%arg0: i32, %arg1: i32) -> (i32, i32) {
    %c0_i32 = arith.constant 0 : i32
    %c0_i32_0 = arith.constant 0 : i32
    %c0_i32_1 = arith.constant 0 : i32
    return %c0_i32, %c0_i32_0 : i32, i32
  }
  func.func @transform_5(%arg0: i32, %arg1: i32) -> (i32, i32, i32, i32) {
    %c0_i32 = arith.constant 0 : i32
    %c0_i32_0 = arith.constant 0 : i32
    %c0_i32_1 = arith.constant 0 : i32
    return %arg0, %arg1, %c0_i32, %c0_i32_0 : i32, i32, i32, i32
  }
  func.func @transform_6(%arg0: i32, %arg1: i32) -> (i32, i32, i32, i32) {
    %c0_i32 = arith.constant 0 : i32
    %c0_i32_0 = arith.constant 0 : i32
    %c0_i32_1 = arith.constant 0 : i32
    return %arg0, %arg1, %c0_i32, %c0_i32_0 : i32, i32, i32, i32
  }
}

module attributes {stable_mosaic.version = 11 : i64} {
  func.func @kernel(%arg0: i32, %arg1: i32, %arg2: memref<1x1x16x78xf32, #tpu.memory_space<vmem>>, %arg3: memref<1x16x1xf32, #tpu.memory_space<vmem>>, %arg4: memref<1x16x1xf32, #tpu.memory_space<vmem>>, %arg5: memref<1x1x4x100xbf16, #tpu.memory_space<vmem>>, %arg6: memref<16x4xbf16, #tpu.memory_space<vmem>>, %arg7: memref<16x1xf32, #tpu.memory_space<vmem>>, %arg8: memref<1x1x16x78xf32, #tpu.memory_space<vmem>>) attributes {dimension_semantics = [#tpu.dimension_semantics<parallel>, #tpu.dimension_semantics<parallel>], iteration_bounds = array<i64: 2, 8>, scalar_prefetch = 0 : i64, scratch_operands = 0 : i64, tpu.core_type = #tpu.core_type<tc>, window_params = [{transform_indices = @transform_0, window_bounds = array<i64: 1, 1, 16, 78>}, {transform_indices = @transform_1, window_bounds = array<i64: 1, 16, 1>}, {transform_indices = @transform_2, window_bounds = array<i64: 1, 16, 1>}, {transform_indices = @transform_3, window_bounds = array<i64: 1, 1, 4, 100>}, {pipeline_mode = #tpu.pipeline_mode<synchronous>, transform_indices = @transform_4, window_bounds = array<i64: 16, 4>}, {pipeline_mode = #tpu.pipeline_mode<synchronous>, transform_indices = @transform_5, window_bounds = array<i64: 16, 1>}, {transform_indices = @transform_6, window_bounds = array<i64: 1, 1, 16, 78>}]} {
    %c0 = arith.constant 0 : index
    %c0_0 = arith.constant 0 : index
    %c0_1 = arith.constant 0 : index
    %c0_2 = arith.constant 0 : index
    %0 = vector.load %arg2[%c0, %c0_0, %c0_1, %c0_2] : memref<1x1x16x78xf32, #tpu.memory_space<vmem>>, vector<1x1x16x78xf32>
    %1 = vector.shape_cast %0 : vector<1x1x16x78xf32> to vector<16x78xf32>
    %c0_3 = arith.constant 0 : index
    %c0_4 = arith.constant 0 : index
    %c0_5 = arith.constant 0 : index
    %2 = vector.load %arg3[%c0_3, %c0_4, %c0_5] : memref<1x16x1xf32, #tpu.memory_space<vmem>>, vector<1x16x1xf32>
    %3 = vector.shape_cast %2 : vector<1x16x1xf32> to vector<16x1xf32>
    %4 = vector.broadcast %3 : vector<16x1xf32> to vector<16x78xf32>
    %5 = arith.mulf %1, %4 : vector<16x78xf32>
    %c0_6 = arith.constant 0 : index
    %c0_7 = arith.constant 0 : index
    %c0_8 = arith.constant 0 : index
    %6 = vector.load %arg4[%c0_6, %c0_7, %c0_8] : memref<1x16x1xf32, #tpu.memory_space<vmem>>, vector<1x16x1xf32>
    %7 = vector.shape_cast %6 : vector<1x16x1xf32> to vector<16x1xf32>
    %8 = vector.broadcast %7 : vector<16x1xf32> to vector<16x78xf32>
    %9 = arith.addf %5, %8 : vector<16x78xf32>
    %10 = arith.negf %9 : vector<16x78xf32>
    %11 = math.exp %10 : vector<16x78xf32>
    %cst = arith.constant 1.000000e+00 : f32
    %12 = vector.broadcast %cst : f32 to vector<16x78xf32>
    %13 = arith.addf %12, %11 : vector<16x78xf32>
    %14 = arith.divf %12, %13 : vector<16x78xf32>
    %15 = arith.mulf %9, %14 : vector<16x78xf32>
    %c0_9 = arith.constant 0 : index
    %c0_10 = arith.constant 0 : index
    %c0_11 = arith.constant 0 : index
    %c0_12 = arith.constant 0 : index
    %16 = vector.load %arg5[%c0_9, %c0_10, %c0_11, %c0_12] : memref<1x1x4x100xbf16, #tpu.memory_space<vmem>>, vector<1x1x4x100xbf16>
    %17 = vector.shape_cast %16 : vector<1x1x4x100xbf16> to vector<4x100xbf16>
    %18 = vector.extract_strided_slice %17 {offsets = [0, 11], sizes = [4, 78], strides = [1, 1]} : vector<4x100xbf16> to vector<4x78xbf16>
    %c0_13 = arith.constant 0 : index
    %c0_14 = arith.constant 0 : index
    %19 = vector.load %arg6[%c0_13, %c0_14] : memref<16x4xbf16, #tpu.memory_space<vmem>>, vector<16x4xbf16>
    %cst_15 = arith.constant dense<0.000000e+00> : vector<16x78xf32>
    %20 = tpu.matmul %19, %18, %cst_15 {dimension_numbers = #tpu.dot_dimension_numbers<[1], [0], [0], [1], [0, 0, 1, 1], [], []>} : vector<16x4xbf16>, vector<4x78xbf16>, vector<16x78xf32> -> vector<16x78xf32>
    %c0_16 = arith.constant 0 : index
    %c0_17 = arith.constant 0 : index
    %21 = vector.load %arg7[%c0_16, %c0_17] : memref<16x1xf32, #tpu.memory_space<vmem>>, vector<16x1xf32>
    %22 = vector.broadcast %21 : vector<16x1xf32> to vector<16x78xf32>
    %23 = arith.addf %20, %22 : vector<16x78xf32>
    %24 = arith.addf %15, %23 : vector<16x78xf32>
    %c0_18 = arith.constant 0 : index
    %c0_19 = arith.constant 0 : index
    %c0_20 = arith.constant 0 : index
    %c0_21 = arith.constant 0 : index
    %25 = vector.load %arg8[%c0_18, %c0_19, %c0_20, %c0_21] : memref<1x1x16x78xf32, #tpu.memory_space<vmem>>, vector<1x1x16x78xf32>
    %26 = vector.shape_cast %25 : vector<1x1x16x78xf32> to vector<16x78xf32>
    %27 = vector.shape_cast %24 : vector<16x78xf32> to vector<1x1x16x78xf32>
    tpu.vector_store %arg8[%c0_18, %c0_19, %c0_20, %c0_21], %27 {strides = array<i32>} : memref<1x1x16x78xf32, #tpu.memory_space<vmem>>, vector<1x1x16x78xf32>,
    return
  }
  func.func @transform_0(%arg0: i32, %arg1: i32) -> (i32, i32, i32, i32) {
    %c0_i32 = arith.constant 0 : i32
    %c0_i32_0 = arith.constant 0 : i32
    %c0_i32_1 = arith.constant 0 : i32
    return %arg0, %arg1, %c0_i32, %c0_i32_0 : i32, i32, i32, i32
  }
  func.func @transform_1(%arg0: i32, %arg1: i32) -> (i32, i32, i32) {
    %c0_i32 = arith.constant 0 : i32
    %c0_i32_0 = arith.constant 0 : i32
    %c0_i32_1 = arith.constant 0 : i32
    return %arg0, %c0_i32, %c0_i32_0 : i32, i32, i32
  }
  func.func @transform_2(%arg0: i32, %arg1: i32) -> (i32, i32, i32) {
    %c0_i32 = arith.constant 0 : i32
    %c0_i32_0 = arith.constant 0 : i32
    %c0_i32_1 = arith.constant 0 : i32
    return %arg0, %c0_i32, %c0_i32_0 : i32, i32, i32
  }
  func.func @transform_3(%arg0: i32, %arg1: i32) -> (i32, i32, i32, i32) {
    %c1_i32 = arith.constant 1 : i32
    %0 = arith.addi %arg1, %c1_i32 : i32
    %c0_i32 = arith.constant 0 : i32
    %c0_i32_0 = arith.constant 0 : i32
    %c0_i32_1 = arith.constant 0 : i32
    return %arg0, %0, %c0_i32, %c0_i32_0 : i32, i32, i32, i32
  }
  func.func @transform_4(%arg0: i32, %arg1: i32) -> (i32, i32) {
    %c0_i32 = arith.constant 0 : i32
    %c0_i32_0 = arith.constant 0 : i32
    %c0_i32_1 = arith.constant 0 : i32
    return %c0_i32, %c0_i32_0 : i32, i32
  }
  func.func @transform_5(%arg0: i32, %arg1: i32) -> (i32, i32) {
    %c0_i32 = arith.constant 0 : i32
    %c0_i32_0 = arith.constant 0 : i32
    %c0_i32_1 = arith.constant 0 : i32
    return %c0_i32, %c0_i32_0 : i32, i32
  }
  func.func @transform_6(%arg0: i32, %arg1: i32) -> (i32, i32, i32, i32) {
    %c0_i32 = arith.constant 0 : i32
    %c0_i32_0 = arith.constant 0 : i32
    %c0_i32_1 = arith.constant 0 : i32
    return %arg0, %arg1, %c0_i32, %c0_i32_0 : i32, i32, i32, i32
  }
}

</mosaic_0001>

<bundles_post_ra>
// kernel: squeeze.4
= control target key start
LH: loop header
LB: loop body
LE: loop exit
PB: predicated region body
PF: predicated region fallthrough
CT: control target
= control target key end

     0   :  { %s67_s8 = smov 122   ;;  %vm8_vm0 = vcmask 15360   ;;  %s68_s11 = smov 124   ;;  %s118_s0 = inlined_call_operand.vmem [shape: f32[2,16], index: 0, kind: input, shape index: {}]   ;;  %s119_s1 = inlined_call_operand.vmem [shape: f32[2,8,2], index: 1, kind: output, shape index: {}]  }
   0x1   :  { %v5_v0 = vld [vmem:[%s118_s0] sm:$0x3]  ;;  %s66_s0 = smov 126   ;;  %s69_s12 = smov 120  }
   0x2   :  { %6 = vst [vmem:[#allocation0] sm:$0x3] %v5_v0  ;;  %s70_s13 = smov 118   ;;  %s71_s14 = smov 116  }
   0x3   :  { %s72_s15 = smov 114  }
   0x9   :  { %v10_v1 = vld [vmem:[#allocation0] sm:$0x3]  }
   0xa   :  { %v22_v2 = vld [vmem:[#allocation0] sm:$0x3]   ;;  %11 = vrot.lane.b32.xlu0 %v10_v1, %s66_s0 }
   0xb   :  { %23 = vrot.lane.b32.xlu1 %v22_v2, %s67_s8  ;;  %v16_v3 = vld [vmem:[#allocation0] sm:$0x3]  }
   0xc   :  { %v28_v4 = vld [vmem:[#allocation0] sm:$0x3]  }
   0xd   :  { %v7_v5 = vld [vmem:[#allocation0] sm:$0x3]  }
   0xe   :  { %9 = vst.msk [vmem:[%s119_s1] ss:$8 sm:$0x3] %vm8_vm0, %v7_v5   ;;  %17 = vrot.lane.b32.xlu0 %v16_v3, %s68_s11  ;;  %v34_v6 = vld [vmem:[#allocation0] sm:$0x3]  }
   0xf   :  { %29 = vrot.lane.b32.xlu1 %v28_v4, %s69_s12  ;;  %v40_v7 = vld [vmem:[#allocation0] sm:$0x3]  }
  0x10   :  { %v46_v8 = vld [vmem:[#allocation0] sm:$0x3]  }
  0x12   :  { %35 = vrot.lane.b32.xlu0 %v34_v6, %s70_s13 }
  0x13   :  { %41 = vrot.lane.b32.xlu1 %v40_v7, %s71_s14 }
  0x16   :  { %47 = vrot.lane.b32.xlu0 %v46_v8, %s72_s15 }
  0x7c   :  { %v12_v9 = vpop.permute.xlu0 %11  }
  0x7d   :  { %v24_v10 = vpop.permute.xlu1 %23   ;;  %52 = vst.msk [vmem:[%s119_s1 + $0x1] ss:$8 sm:$0x3] %vm8_vm0, %v12_v9  }
  0x7e   :  { %54 = vst.msk [vmem:[%s119_s1 + $0x3] ss:$8 sm:$0x3] %vm8_vm0, %v24_v10  }
  0x80   :  { %v18_v11 = vpop.permute.xlu0 %17  }
  0x81   :  { %v30_v12 = vpop.permute.xlu1 %29   ;;  %53 = vst.msk [vmem:[%s119_s1 + $0x2] ss:$8 sm:$0x3] %vm8_vm0, %v18_v11  }
  0x82   :  { %55 = vst.msk [vmem:[%s119_s1 + $0x4] ss:$8 sm:$0x3] %vm8_vm0, %v30_v12  }
  0x84   :  { %v36_v13 = vpop.permute.xlu0 %35  }
  0x85   :  { %v42_v14 = vpop.permute.xlu1 %41   ;;  %56 = vst.msk [vmem:[%s119_s1 + $0x5] ss:$8 sm:$0x3] %vm8_vm0, %v36_v13  }
  0x86   :  { %57 = vst.msk [vmem:[%s119_s1 + $0x6] ss:$8 sm:$0x3] %vm8_vm0, %v42_v14  }
  0x88   :  { %v48_v15 = vpop.permute.xlu0 %47  }
  0x89   :  { %58 = vst.msk [vmem:[%s119_s1 + $0x7] ss:$8 sm:$0x3] %vm8_vm0, %v48_v15  }

// kernel: _lambda_.5
= control target key start
LH: loop header
LB: loop body
LE: loop exit
PB: predicated region body
PF: predicated region fallthrough
CT: control target
= control target key end

     0   :  { %s627_s15 = smov 0   ;;  %s629_s16 = smov 0   ;;  %s691_s0 = inlined_call_operand.vmem [shape: f32[2,8,16,78], index: 0, kind: input, shape index: {}]   ;;  %s692_s1 = inlined_call_operand.vmem [shape: f32[2,16,1], index: 1, kind: input, shape index: {}]   ;;  %s693_s2 = inlined_call_operand.vmem [shape: f32[2,16,1], index: 2, kind: input, shape index: {}]   ;;  %s694_s3 = inlined_call_operand.vmem [shape: f32[2,16,1], index: 3, kind: input, shape index: {}]   ;;  %s695_s4 = inlined_call_operand.vmem [shape: f32[2,8,16,78], index: 4, kind: output, shape index: {}]  }
   0x1   :  { %s631_s17 = smov 0   ;;  %s633_s18 = smov 0  }
   0x2   :  { %s635_s19 = smov 0  }
   0x3 LB: > { %s23_s20 = sadd.s32 1, %s591_s17  ;;  %s26_s21 = sadd.s32 1, %s595_s18  ;;  %s599_s19 = sphi %s635_s19, %s14_s19   ;;  %s595_s18 = sphi %s633_s18, %s699_s18   ;;  %s591_s17 = sphi %s631_s17, %s698_s17   ;;  %s587_s16 = sphi %s629_s16, %s697_s16   ;;  %s583_s15 = sphi %s627_s15, %s696_s15  }
   0x4   : > { %p24_p0 = scmp.ge.s32.totalorder %s23_s20, 8  ;;  %p490_p1 = scmp.ge.s32.totalorder %s599_s19, 1 }
   0x5   : > { %p212_p2 = scmp.lt.s32.totalorder %s599_s19, 17 }
   0x6   : > { %s701_s20 = smov (%p24_p0, %s23_s20), 0  ;;  %s703_s21 = smov (!%p24_p0, %s26_s21), %s595_s18 }
   0x7   : > { %p213_p3 = pnand %p490_p1, %p212_p2  ;;  %p28_p4 = scmp.ge.s32.totalorder %s703_s21, 2 }
   0x8   : > { %p261_p5 = scmp.lt.s32.totalorder (!%p213_p3), %s587_s16, 1  ;;  %p263_p6 = scmp.lt.s32.totalorder (!%p213_p3), %s583_s15, 7 }
   0x9   : > { %s705_s21 = smov (%p28_p4, %s703_s21), 0  ;;  %216 = sbr.rel (%p213_p3) target bundleno = 188 (0xbc), region = 36 }
   0xe   : > { %v601_v0 = vmov 0   ;;  %s707_s16 = smov (!%p261_p5, %s587_s16), 1  ;;  %s709_s15 = smov (!%p263_p6, %s583_s15), 7  ;;  %vm352_vm0 = vcmask 637952  }
   0xf   : > { %552 = vset.pattern.permute.xlu1 %v601_v0  ;;  %551 = vset.pattern.permute.xlu0 %v601_v0  ;;  %s492_s22 = sshll.u32 %s707_s16, 4  ;;  %s491_s6 = sshll.u32 %s709_s15, 1 }
  0x10   : > { %s279_s25 = scalar_lea.vmem %s693_s2, %s492_s22  ;;  %s274_s28 = scalar_lea.vmem %s692_s1, %s492_s22 }
  0x11   : > { %v310_v1 = vld [vmem:[%s279_s25] sm:$0xff]  ;;  %v311_v3 = vld [vmem:[%s279_s25 + $0x8] sm:$0xff]  ;;  %s284_s5 = scalar_lea.vmem %s694_s3, %s492_s22  ;;  %s267_s7 = sadd.s32 %s492_s22, %s491_s6 }
  0x12   : > { %v296_v2 = vld [vmem:[%s274_s28] sm:$0xff]  ;;  %314 = vperm.xlu1 %552, %v310_v1   ;;  %v297_v4 = vld [vmem:[%s274_s28 + $0x8] sm:$0xff]  ;;  %s493_s8 = sshll.u32 %s267_s7, 3 }
  0x13   : > { %300 = vperm.xlu0 %551, %v296_v2   ;;  %v339_v5 = vld [vmem:[%s284_s5 + $0x8] sm:$0xff]  ;;  %v338_v6 = vld [vmem:[%s284_s5] sm:$0xff]  ;;  %s269_s11 = scalar_lea.vmem %s691_s0, %s493_s8  ;;  %s293_s14 = scalar_lea.vmem %s695_s4, %s493_s8 }
  0x14   : > { %v294_v7 = vld [vmem:[%s269_s11] sm:$0xff]  ;;  %v295_v11 = vld [vmem:[%s269_s11 + $0x8] sm:$0xff] }
  0x16   : > { %319 = vperm.xlu1 %552, %v311_v3  }
  0x17   : > { %305 = vperm.xlu0 %551, %v297_v4  }
  0x1a   : > { %347 = vperm.xlu1 %552, %v339_v5  }
  0x1b   : > { %342 = vperm.xlu0 %551, %v338_v6  }
  0x8d   : > { %v315_v8 = vpop.permute.xlu1 %314 }
  0x8e   : > { %v301_v9 = vpop.permute.xlu0 %300 }
  0x8f   : > { %v308_v10 = vmul.f32 %v301_v9, %v294_v7 }
  0x91   : > { %v322_v12 = vadd.f32 %v315_v8, %v308_v10  ;;  %v320_v16 = vpop.permute.xlu1 %319 }
  0x92   : > { %v306_v13 = vpop.permute.xlu0 %305 }
  0x93   : > { %v503_v14 = vmul.f32 -1.442695, %v322_v12  ;;  %v309_v15 = vmul.f32 %v306_v13, %v295_v11 }
  0x95   : > { %553 = vpow2.f32 %v503_v14  ;;  %v323_v17 = vadd.f32 %v320_v16, %v309_v15  ;;  %v348_v29 = vpop.permute.xlu1 %347 }
  0x96   : > { %v343_v25 = vpop.permute.xlu0 %342 }
  0x97   : > { %v504_v18 = vmul.f32 -1.442695, %v323_v17 }
  0x99   : > { %555 = vpow2.f32 %v504_v18 }
  0xa2   : > { %v554_v19 = vpop.eup %553 }
  0xa3   : > { %v330_v20 = vadd.f32 1.0, %v554_v19 }
  0xa5   : > { %557 = vrcp.f32 %v330_v20 }
  0xa6   : > { %v556_v21 = vpop.eup %555 }
  0xa7   : > { %v331_v22 = vadd.f32 1.0, %v556_v21 }
  0xa9   : > { %559 = vrcp.f32 %v331_v22 }
  0xb2   : > { %v558_v23 = vpop.eup %557 }
  0xb3   : > { %v336_v24 = vmul.f32 %v558_v23, %v322_v12 }
  0xb5   : > { %v350_v26 = vadd.f32 %v343_v25, %v336_v24 }
  0xb6   : > { %v560_v27 = vpop.eup %559 }
  0xb7   : > { %v337_v28 = vmul.f32 %v560_v27, %v323_v17  ;;  %353 = vst.msk [vmem:[%s293_s14] sm:$0xff] %vm352_vm0, %v350_v26 }
  0xb9   : > { %v351_v30 = vadd.f32 %v348_v29, %v337_v28 }
  0xbb   : > { %354 = vst.msk [vmem:[%s293_s14 + $0x8] sm:$0xff] %vm352_vm0, %v351_v30 }
  0xbc PF: > { %s14_s19 = sadd.s32 1, %s599_s19   ;;  %s696_s15 = smov %s591_s17 }
  0xbd   : > { %p11_p7 = scmp.ge.s32.totalorder %s14_s19, 18   ;;  %s697_s16 = smov %s595_s18 }
  0xbe   : > { %s698_s17 = smov %s701_s20  ;;  %s699_s18 = smov %s705_s21 }
  0xbf   :  { %13 = sbr.rel (!%p11_p7) target bundleno = 3 (0x3), region = 75 }

// kernel: _lambda_.4
= control target key start
LH: loop header
LB: loop body
LE: loop exit
PB: predicated region body
PF: predicated region fallthrough
CT: control target
= control target key end

     0   :  { %s1168_s21 = smov 0   ;;  %s1170_s22 = smov 0   ;;  %s1349_s0 = inlined_call_operand.vmem [shape: bf16[2,10,4,100], index: 0, kind: input, shape index: {}, may-alias: {0,1,2}]   ;;  %s1350_s1 = inlined_call_operand.vmem [shape: bf16[2,10,4,100], index: 1, kind: input, shape index: {}, may-alias: {0,1,2}]   ;;  %s1351_s2 = inlined_call_operand.vmem [shape: bf16[2,10,4,100], index: 2, kind: input, shape index: {}, may-alias: {0,1,2}]   ;;  %s1352_s3 = inlined_call_operand.vmem [shape: bf16[3,16,36], index: 3, kind: input, shape index: {}]   ;;  %s1353_s4 = inlined_call_operand.vmem [shape: f32[16,1], index: 4, kind: input, shape index: {}]   ;;  %s1354_s5 = inlined_call_operand.vmem [shape: f32[2,8,16,78], index: 5, kind: output, shape index: {0}]   ;;  %s1355_s6 = inlined_call_operand.vmem [shape: f32[2,8,16,2], index: 6, kind: output, shape index: {1}]  }
   0x1   :  { %s1172_s23 = smov 0   ;;  %s1174_s24 = smov 0  }
   0x2   :  { %s1176_s25 = smov 0  }
   0x3 LB: > { %s26_s26 = sadd.s32 1, %s1111_s23  ;;  %s29_s27 = sadd.s32 1, %s1115_s24  ;;  %s1119_s25 = sphi %s1176_s25, %s17_s25   ;;  %s1115_s24 = sphi %s1174_s24, %s1359_s24   ;;  %s1111_s23 = sphi %s1172_s23, %s1358_s23   ;;  %s1107_s22 = sphi %s1170_s22, %s1357_s22   ;;  %s1103_s21 = sphi %s1168_s21, %s1356_s21  }
   0x4   : > { %p27_p0 = scmp.ge.s32.totalorder %s26_s26, 8  ;;  %p953_p1 = scmp.ge.s32.totalorder %s1119_s25, 1 }
   0x5   : > { %p274_p2 = scmp.lt.s32.totalorder %s1119_s25, 17 }
   0x6   : > { %s1361_s26 = smov (%p27_p0, %s26_s26), 0  ;;  %s1363_s27 = smov (!%p27_p0, %s29_s27), %s1115_s24 }
   0x7   : > { %p275_p3 = pnand %p953_p1, %p274_p2  ;;  %p31_p4 = scmp.ge.s32.totalorder %s1363_s27, 2 }
   0x8   : > { %p338_p5 = scmp.lt.s32.totalorder (!%p275_p3), %s1107_s22, 1  ;;  %s346_s28 = sadd.s32 (!%p275_p3), 1, %s1103_s21 }
   0x9   : > { %s1365_s27 = smov (%p31_p4, %s1363_s27), 0  ;;  %278 = sbr.rel (%p275_p3) target bundleno = 535 (0x217), region = 40 }
   0xa   : > { %p349_p6 = scmp.lt.s32.totalorder (!%p275_p3), %s346_s28, 9  ;;  %p340_p7 = scmp.lt.s32.totalorder (!%p275_p3), %s1103_s21, 9 }
   0xb   : > { %s356_s13 = sadd.s32 (!%p275_p3), 2, %s1103_s21  ;;  %s1123_s14 = smov (!%p275_p3), 106  }
   0xc   : > { %p359_p8 = scmp.lt.s32.totalorder (!%p275_p3), %s356_s13, 9  ;;  %s1124_s19 = smov (!%p275_p3), 117  }
   0xd   : > { %s1125_s20 = smov (!%p275_p3), 116   ;;  %s1127_s8 = smov (!%p275_p3), 108  }
   0xe   : > { %v391_v0 = vlaneseq  ;;  %v1121_v1 = vmov 1983009808   ;;  %s1367_s22 = smov (!%p338_p5, %s1107_s22), 1  ;;  %s1369_s28 = smov (!%p349_p6, %s346_s28), 9  ;;  %v1122_v5 = vmov 0.0   ;;  %vm1129_vm0 = vmmov 0  }
   0xf   : > { %v389_v2 = vunpack.c.l.s4 %v1121_v1  ;;  %s1205_s29 = smul.u32 10, %s1367_s22  ;;  %988 = vmatprep.subr.bf16.mxu0 %v1122_v5  ;;  %998 = vmatprep.subr.bf16.mxu1 %v1122_v5  ;;  %s1371_s13 = smov (!%p359_p8, %s356_s13), 9  ;;  %v1132_v25 = vmov 0   ;;  %v708_v26 = vld [vmem:[%s1353_s4] sm:$0xff]  ;;  %v709_v27 = vld [vmem:[%s1353_s4 + $0x8] sm:$0xff]  ;;  %vm420_vm1 = vcmask 1041408  }
  0x10   : > { %v392_v3 = vshrl.u32 %v391_v0, 7  ;;  %s341_s11 = scalar_select %p340_p7, %s1103_s21, 9  ;;  %994 = vmatprep.mubr.msk.bf16.mxu0 %vm1129_vm0, %v1122_v5  ;;  %1004 = vmatprep.mubr.msk.bf16.mxu1 %vm1129_vm0, %v1122_v5  ;;  %vm424_vm2 = vcmask 1043456   ;;  %vm427_vm3 = vcmask 1045504   ;;  %v1078_v47 = vld [vmem:[%s1352_s3 + $0x8] sm:$0xff]   ;;  %vm500_vm4 = vcmask 293888  }
  0x11   : > { %v390_v4 = vunpack.c.0.s8 %v389_v2  ;;  %s352_s30 = sadd.s32 %s1205_s29, %s1369_s28  ;;  %s362_s28 = sadd.s32 %s1205_s29, %s1371_s13  ;;  %1073 = vset.pattern.permute.xlu0 %v1132_v25  ;;  %1074 = vset.pattern.permute.xlu1 %v1132_v25  ;;  %vm722_vm9 = vcmask 637952   ;;  %vm762_vm10 = vcmask 7168   ;;  %vm765_vm11 = vcmask 15360  }
  0x12   : > { %s955_s7 = sshll.u32 %s352_s30, 1  ;;  %s343_s12 = sadd.s32 %s1205_s29, %s341_s11 }
  0x13   : > { %v393_v6 = vsub.s32 %v390_v4, %v392_v3  ;;  %s354_s10 = scalar_lea.vmem %s1350_s1, %s955_s7  ;;  %s954_s15 = sshll.u32 %s343_s12, 1 }
  0x14   : > { %v1214_v7 = vld [vmem:[%s354_s10] sm:$0x3]  ;;  %s345_s18 = scalar_lea.vmem %s1349_s0, %s954_s15  ;;  %s1126_s30 = smov 126  }
  0x15   : > { %v457_v8 = vrot.slane %v1214_v7, %v393_v6  ;;  %v443_v9 = vcombine.low %v1214_v7, %v1214_v7  ;;  %v1226_v10 = vld [vmem:[%s345_s18] sm:$0x3]  ;;  %s956_s7 = sshll.u32 %s362_s28, 1  ;;  %s1128_s12 = smov 107  }
  0x16   : > { %v401_v11 = vrot.slane %v1226_v10, %v393_v6  ;;  %v387_v15 = vcombine.low %v1226_v10, %v1226_v10  ;;  %s364_s11 = scalar_lea.vmem %s1351_s2, %s956_s7  ;;  %s1130_s29 = smov 127  }
  0x17   : > { %474 = vrot.lane.b32.xlu0 %v457_v8, %s1123_s14  ;;  %v450_v12 = vrot.slane %v443_v9, %v393_v6  ;;  %v460_v13 = vcombine.low %v457_v8, %v457_v8  ;;  %v1244_v17 = vld [vmem:[%s364_s11] sm:$0x3]  ;;  %s1131_s13 = smov 118   ;;  %p368_p9 = scmp.lt.s32.totalorder %s1103_s21, 7 }
  0x18   : > { %410 = vrot.lane.b32.xlu1 %v401_v11, %s1124_s19  ;;  %v394_v16 = vrot.slane %v387_v15, %v393_v6  ;;  %v404_v18 = vcombine.low %v401_v11, %v401_v11  ;;  %v616_v19 = vrot.slane %v1244_v17, %v393_v6  ;;  %v602_v21 = vcombine.low %v1244_v17, %v1244_v17  ;;  %s958_s9 = sshll.u32 %s1367_s22, 4 }
  0x19   : > { %v463_v14 = vcombine.low %v450_v12, %v450_v12  ;;  %s1373_s21 = smov (!%p368_p9, %s1103_s21), 7 }
  0x1a   : > { %v407_v20 = vcombine.low %v394_v16, %v394_v16  ;;  %v619_v22 = vcombine.low %v616_v19, %v616_v19  ;;  %v609_v23 = vrot.slane %v602_v21, %v393_v6  ;;  %v1079_v6 = vld [vmem:[%s1352_s3] sm:$0xff]  }
  0x1b   : > { %466 = vrot.lane.b32.xlu0 %v457_v8, %s1124_s19 }
  0x1c   : > { %468 = vrot.lane.b32.xlu1 %v450_v12, %s1125_s20  ;;  %v622_v24 = vcombine.low %v609_v23, %v609_v23 }
  0x1f   : > { %418 = vrot.lane.b32.xlu0 %v401_v11, %s1123_s14 }
  0x20   : > { %470 = vrot.lane.b32.xlu1 %v460_v13, %s1127_s8 }
  0x23   : > { %461 = vrot.lane.b32.xlu0 %v460_v13, %s1126_s30  ;;  %v1080_v13 = vld [vmem:[%s1352_s3 + $0x10] sm:$0xff]  }
  0x24   : > { %458 = vrot.lane.b32.xlu1 %v450_v12, %s1130_s29 }
  0x27   : > { %472 = vrot.lane.b32.xlu0 %v463_v14, %s1128_s12 }
  0x28   : > { %464 = vrot.lane.b32.xlu1 %v463_v14, %s1131_s13  ;;  %v726_v14 = vand.u32 127, %v391_v0 }
  0x2b   : > { %412 = vrot.lane.b32.xlu0 %v394_v16, %s1125_s20 }
  0x2c   : > { %633 = vrot.lane.b32.xlu1 %v616_v19, %s1123_s14 }
  0x2f   : > { %414 = vrot.lane.b32.xlu0 %v404_v18, %s1127_s8 }
  0x30   : > { %416 = vrot.lane.b32.xlu1 %v407_v20, %s1128_s12 }
  0x33   : > { %625 = vrot.lane.b32.xlu0 %v616_v19, %s1124_s19 }
  0x34   : > { %627 = vrot.lane.b32.xlu1 %v609_v23, %s1125_s20 }
  0x37   : > { %629 = vrot.lane.b32.xlu0 %v619_v22, %s1127_s8  ;;  %s957_s8 = sshll.u32 %s1373_s21, 1 }
  0x38   : > { %402 = vrot.lane.b32.xlu1 %v394_v16, %s1130_s29  ;;  %v1307_v15 = vmul.u32.u64.low 3435973837, %v726_v14  ;;  %v1308_v16 = vmul.u32.u64.high 3435973837, %v726_v14, %v1307_v15  ;;  %s1314_s10 = sadd.s32 %s958_s9, %s957_s8 }
  0x39   : > { %s959_s11 = sshll.u32 %s1314_s10, 3 }
  0x3a   : > { %v733_v21 = vshrl.u32 %v1308_v16, 3  ;;  %s374_s21 = scalar_lea.vmem %s1354_s5, %s959_s11  ;;  %s383_s14 = scalar_lea.vmem %s1355_s6, %s959_s11 }
  0x3b   : > { %631 = vrot.lane.b32.xlu0 %v622_v24, %s1128_s12 }
  0x3c   : > { %405 = vrot.lane.b32.xlu1 %v404_v18, %s1126_s30 }
  0x3f   : > { %408 = vrot.lane.b32.xlu0 %v407_v20, %s1131_s13 }
  0x40   : > { %617 = vrot.lane.b32.xlu1 %v609_v23, %s1130_s29 }
  0x43   : > { %620 = vrot.lane.b32.xlu0 %v619_v22, %s1126_s30  ;;  %v734_v22 = vmul.u32 10, %v733_v21 }
  0x44   : > { %623 = vrot.lane.b32.xlu1 %v622_v24, %s1131_s13 }
  0x45   : > { %v735_v23 = vsub.s32 %v726_v14, %v734_v22 }
  0x47   : > { %712 = vperm.xlu0 %1073, %v708_v26   ;;  %vm738_vm5 = vcmp.ne.s32.totalorder %v735_v23, 0  ;;  %vm739_vm6 = vcmp.lt.s32.totalorder %v735_v23, 0  ;;  %v741_v24 = vadd.s32 10, %v735_v23 }
  0x48   : > { %717 = vperm.xlu1 %1074, %v709_v27   ;;  %vm740_vm7 = vmand %vm739_vm6, %vm738_vm5 }
  0x49   : > { %v742_v26 = vsel %vm740_vm7, %v741_v24, %v735_v23 }
  0x4a   : > { %vm743_vm8 = vcmp.lt.s32.totalorder %v742_v26, 8 }
  0x89   : > { %v475_v28 = vpop.permute.xlu0 %474 }
  0x8a   : > { %v505_v29 = vsel %vm420_vm1, %v475_v28, 0  ;;  %v411_v31 = vpop.permute.xlu1 %410 }
  0x8b   : > { %989 = vmatpush3.bf16.msra.mxu0 %v505_v29 }
  0x8c   : > { %990 = vmatprep.subr.bf16.mxu0 %v1122_v5 }
  0x8d   : > { %v467_v30 = vpop.permute.xlu0 %466 }
  0x8e   : > { %v469_v33 = vpop.permute.xlu1 %468 }
  0x8f   : > { %v486_v37 = vsel %vm420_vm1, %v467_v30, %v469_v33 }
  0x91   : > { %v419_v32 = vpop.permute.xlu0 %418 }
  0x92   : > { %v557_v34 = vsel %vm420_vm1, %v419_v32, 0  ;;  %v471_v36 = vpop.permute.xlu1 %470 }
  0x93   : > { %999 = vmatpush3.bf16.msra.mxu1 %v557_v34  ;;  %v488_v38 = vsel %vm424_vm2, %v486_v37, %v471_v36  ;;  %v973_v34 = vsel %vm743_vm8, 1.0, %v1122_v5 }
  0x94   : > { %1000 = vmatprep.subr.bf16.mxu1 %v1122_v5 }
  0x95   : > { %v462_v35 = vpop.permute.xlu0 %461 }
  0x96   : > { %v459_v40 = vpop.permute.xlu1 %458 }
  0x97   : > { %v478_v42 = vsel %vm420_vm1, %v1214_v7, %v459_v40 }
  0x98   : > { %v480_v44 = vsel %vm424_vm2, %v478_v42, %v462_v35 }
  0x99   : > { %v473_v39 = vpop.permute.xlu0 %472 }
  0x9a   : > { %v490_v41 = vsel %vm427_vm3, %v488_v38, %v473_v39  ;;  %v465_v45 = vpop.permute.xlu1 %464 }
  0x9b   : > { %991 = vmatpush3.bf16.msra.mxu0 %v490_v41  ;;  %v482_v46 = vsel %vm427_vm3, %v480_v44, %v465_v45 }
  0x9c   : > { %992 = vmatprep.subr.bf16.mxu0 %v1122_v5 }
  0x9d   : > { %v413_v43 = vpop.permute.xlu0 %412 }
  0x9e   : > { %v634_v49 = vpop.permute.xlu1 %633  ;;  %v433_v51 = vsel %vm420_vm1, %v411_v31, %v413_v43 }
  0x9f   : > { %993 = vmatpush3.bf16.msra.mxu0 %v482_v46  ;;  %v663_v50 = vsel %vm420_vm1, %v634_v49, 0 }
  0xa0   : > { %1008 = vmatprep.subr.bf16.mxu0 %v1122_v5 }
  0xa1   : > { %v415_v48 = vpop.permute.xlu0 %414 }
  0xa2   : > { %995 = vmatmul.mubr.msk.bf16.vlgmr.msra.gmra.mxu0 %vm500_vm4, %v1078_v47  ;;  %v435_v52 = vsel %vm424_vm2, %v433_v51, %v415_v48  ;;  %v417_v54 = vpop.permute.xlu1 %416 }
  0xa3   : > { %1009 = vmatpush3.bf16.msra.mxu0 %v663_v50  ;;  %1014 = vmatprep.mubr.msk.bf16.mxu0 %vm1129_vm0, %v1122_v5  ;;  %v437_v55 = vsel %vm427_vm3, %v435_v52, %v417_v54 }
  0xa4   : > { %1010 = vmatprep.subr.bf16.mxu0 %v1122_v5  ;;  %1001 = vmatpush3.bf16.msra.mxu1 %v437_v55 }
  0xa5   : > { %v626_v53 = vpop.permute.xlu0 %625  ;;  %1002 = vmatprep.subr.bf16.mxu1 %v1122_v5 }
  0xa6   : > { %v628_v57 = vpop.permute.xlu1 %627 }
  0xa7   : > { %v645_v58 = vsel %vm420_vm1, %v626_v53, %v628_v57 }
  0xa9   : > { %v630_v56 = vpop.permute.xlu0 %629 }
  0xaa   : > { %v647_v59 = vsel %vm424_vm2, %v645_v58, %v630_v56  ;;  %v403_v61 = vpop.permute.xlu1 %402 }
  0xab   : > { %v423_v1 = vsel %vm420_vm1, %v1226_v10, %v403_v61 }
  0xad   : > { %v632_v60 = vpop.permute.xlu0 %631 }
  0xae   : > { %v649_v62 = vsel %vm427_vm3, %v647_v59, %v632_v60  ;;  %v406_v2 = vpop.permute.xlu1 %405 }
  0xaf   : > { %1011 = vmatpush3.bf16.msra.mxu0 %v649_v62  ;;  %v426_v3 = vsel %vm424_vm2, %v423_v1, %v406_v2 }
  0xb0   : > { %1012 = vmatprep.subr.bf16.mxu0 %v1122_v5 }
  0xb1   : > { %v409_v63 = vpop.permute.xlu0 %408 }
  0xb2   : > { %v429_v4 = vsel %vm427_vm3, %v426_v3, %v409_v63  ;;  %v618_v8 = vpop.permute.xlu1 %617 }
  0xb3   : > { %1003 = vmatpush3.bf16.msra.mxu1 %v429_v4  ;;  %v637_v9 = vsel %vm420_vm1, %v1244_v17, %v618_v8 }
  0xb5   : > { %v621_v7 = vpop.permute.xlu0 %620 }
  0xb6   : > { %v639_v11 = vsel %vm424_vm2, %v637_v9, %v621_v7  ;;  %1005 = vmatmul.mubr.msk.bf16.vlgmr.msra.gmra.mxu1 %vm500_vm4, %v1079_v6  ;;  %v624_v10 = vpop.permute.xlu1 %623 }
  0xb7   : > { %v641_v12 = vsel %vm427_vm3, %v639_v11, %v624_v10 }
  0xb8   : > { %1013 = vmatpush3.bf16.msra.mxu0 %v641_v12 }
  0xbb   : > { %1015 = vmatmul.mubr.msk.bf16.vlgmr.msra.gmra.mxu0 %vm500_vm4, %v1080_v13 }
  0xc2   : > { %v713_v31 = vpop.permute.xlu0 %712 }
  0xc3   : > { %v718_v38 = vpop.permute.xlu1 %717 }
 0x162   : > { %v541_v17 = vpop.f32.mrf.mxu0 }
 0x164   : > { %v996_v18 = vpop.f32.mrf.mxu0 }
 0x166   : > { %v544_v19 = vpop.f32.mrf.mxu0 }
 0x168   : > { %v997_v20 = vpop.f32.mrf.mxu0 }
 0x176   : > { %v593_v25 = vpop.f32.mrf.mxu1 }
 0x177   : > { %v594_v28 = vadd.f32 %v593_v25, %v541_v17 }
 0x178   : > { %v1006_v0 = vpop.f32.mrf.mxu1 }
 0x17a   : > { %v596_v27 = vpop.f32.mrf.mxu1 }
 0x17b   : > { %v699_v30 = vpop.f32.mrf.mxu0  ;;  %v597_v35 = vadd.f32 %v596_v27, %v544_v19 }
 0x17c   : > { %v1007_v29 = vpop.f32.mrf.mxu1  ;;  %v706_v32 = vadd.f32 %v699_v30, %v594_v28 }
 0x17d   : > { %v1016_v33 = vpop.f32.mrf.mxu0 }
 0x17e   : > { %v720_v36 = vadd.f32 %v713_v31, %v706_v32 }
 0x17f   : > { %v702_v37 = vpop.f32.mrf.mxu0 }
 0x180   : > { %723 = vst.msk [vmem:[%s374_s21] sm:$0xff] %vm722_vm9, %v720_v36  ;;  %v707_v39 = vadd.f32 %v702_v37, %v597_v35  ;;  %v746_v40 = vmul.f32 %v973_v34, %v720_v36 }
 0x181   : > { %v1017_v41 = vpop.f32.mrf.mxu0 }
 0x182   : > { %v721_v42 = vadd.f32 %v718_v38, %v707_v39  ;;  %v748_v43 = vsel %vm722_vm9, %v746_v40, 0.0  ;;  %v754_v46 = vmul.f32 %v746_v40, %v720_v36 }
 0x183   : > { %749 = vadd.xlane.f32.xlu1 %v748_v43 }
 0x184   : > { %724 = vst.msk [vmem:[%s374_s21 + $0x8] sm:$0xff] %vm722_vm9, %v721_v42  ;;  %v747_v44 = vmul.f32 %v973_v34, %v721_v42  ;;  %v756_v48 = vsel %vm722_vm9, %v754_v46, 0.0 }
 0x186   : > { %v751_v45 = vsel %vm722_vm9, %v747_v44, 0.0  ;;  %v755_v5 = vmul.f32 %v747_v44, %v721_v42 }
 0x187   : > { %752 = vadd.xlane.f32.xlu0 %v751_v45 }
 0x188   : > { %v759_v47 = vsel %vm722_vm9, %v755_v5, 0.0 }
 0x189   : > { %760 = vadd.xlane.f32.xlu1 %v759_v47 }
 0x18b   : > { %757 = vadd.xlane.f32.xlu0 %v756_v48 }
 0x20c   : > { %v750_v49 = vpop.xlane.xlu1 %749 }
 0x210   : > { %v753_v50 = vpop.xlane.xlu0 %752 }
 0x212   : > { %v761_v51 = vpop.xlane.xlu1 %760 }
 0x213   : > { %v764_v52 = vsel %vm762_vm10, %v753_v50, %v761_v51 }
 0x214   : > { %767 = vst.msk [vmem:[%s383_s14 + $0x8] sm:$0xff] %vm765_vm11, %v764_v52  ;;  %v758_v53 = vpop.xlane.xlu0 %757 }
 0x215   : > { %v763_v54 = vsel %vm762_vm10, %v750_v49, %v758_v53 }
 0x216   : > { %766 = vst.msk [vmem:[%s383_s14] sm:$0xff] %vm765_vm11, %v763_v54 }
 0x217 PF: > { %s17_s25 = sadd.s32 1, %s1119_s25   ;;  %s1356_s21 = smov %s1111_s23 }
 0x218   : > { %p14_p10 = scmp.ge.s32.totalorder %s17_s25, 18   ;;  %s1357_s22 = smov %s1115_s24 }
 0x219   : > { %s1358_s23 = smov %s1361_s26  ;;  %s1359_s24 = smov %s1365_s27 }
 0x21a   :  { %16 = sbr.rel (!%p14_p10) target bundleno = 3 (0x3), region = 90 }

// kernel: _lambda_.6
= control target key start
LH: loop header
LB: loop body
LE: loop exit
PB: predicated region body
PF: predicated region fallthrough
CT: control target
= control target key end

     0   :  { %s1098_s21 = smov 0   ;;  %s1100_s22 = smov 0   ;;  %s1282_s0 = inlined_call_operand.vmem [shape: bf16[2,10,16,100], index: 0, kind: input, shape index: {}, may-alias: {0,1,2}]   ;;  %s1283_s1 = inlined_call_operand.vmem [shape: bf16[2,10,16,100], index: 1, kind: input, shape index: {}, may-alias: {0,1,2}]   ;;  %s1284_s2 = inlined_call_operand.vmem [shape: bf16[2,10,16,100], index: 2, kind: input, shape index: {}, may-alias: {0,1,2}]   ;;  %s1285_s3 = inlined_call_operand.vmem [shape: bf16[3,16,144], index: 3, kind: input, shape index: {}]   ;;  %s1286_s4 = inlined_call_operand.vmem [shape: f32[16,1], index: 4, kind: input, shape index: {}]   ;;  %s1287_s5 = inlined_call_operand.vmem [shape: f32[2,8,16,78], index: 5, kind: output, shape index: {0}]   ;;  %s1288_s6 = inlined_call_operand.vmem [shape: f32[2,8,16,2], index: 6, kind: output, shape index: {1}]  }
   0x1   :  { %s1102_s23 = smov 0   ;;  %s1104_s24 = smov 0  }
   0x2   :  { %s1106_s25 = smov 0  }
   0x3 LB: > { %s26_s26 = sadd.s32 1, %s1043_s23  ;;  %s29_s27 = sadd.s32 1, %s1047_s24  ;;  %s1051_s25 = sphi %s1106_s25, %s17_s25   ;;  %s1047_s24 = sphi %s1104_s24, %s1298_s24   ;;  %s1043_s23 = sphi %s1102_s23, %s1297_s23   ;;  %s1039_s22 = sphi %s1100_s22, %s1296_s22   ;;  %s1035_s21 = sphi %s1098_s21, %s1295_s21  }
   0x4   : > { %p27_p0 = scmp.ge.s32.totalorder %s26_s26, 8  ;;  %p914_p1 = scmp.ge.s32.totalorder %s1051_s25, 1 }
   0x5   : > { %p277_p2 = scmp.lt.s32.totalorder %s1051_s25, 17 }
   0x6   : > { %s1300_s26 = smov (%p27_p0, %s26_s26), 0  ;;  %s1302_s27 = smov (!%p27_p0, %s29_s27), %s1047_s24 }
   0x7   : > { %p278_p3 = pnand %p914_p1, %p277_p2  ;;  %p31_p4 = scmp.ge.s32.totalorder %s1302_s27, 2 }
   0x8   : > { %p344_p5 = scmp.lt.s32.totalorder (!%p278_p3), %s1039_s22, 1  ;;  %s353_s28 = sadd.s32 (!%p278_p3), 1, %s1035_s21 }
   0x9   : > { %s1304_s27 = smov (%p31_p4, %s1302_s27), 0  ;;  %281 = sbr.rel (%p278_p3) target bundleno = 555 (0x22b), region = 40 }
   0xa   : > { %p356_p6 = scmp.lt.s32.totalorder (!%p278_p3), %s353_s28, 9  ;;  %p346_p7 = scmp.lt.s32.totalorder (!%p278_p3), %s1035_s21, 9 }
   0xb   : > { %s1291_s12 = smov (!%p278_p3), 107   ;;  %s1289_s13 = smov (!%p278_p3), 116  }
   0xc   : > { %s364_s15 = sadd.s32 (!%p278_p3), 2, %s1035_s21  ;;  %s1056_s18 = smov (!%p278_p3), 108  }
   0xd   : > { %p367_p8 = scmp.lt.s32.totalorder (!%p278_p3), %s364_s15, 9  ;;  %s1057_s19 = smov (!%p278_p3), 117  }
   0xe   : > { %v1053_v0 = vmov 0   ;;  %s1306_s22 = smov (!%p344_p5, %s1039_s22), 1  ;;  %s1308_s28 = smov (!%p356_p6, %s353_s28), 9  ;;  %v1006_v4 = vld [vmem:[%s1285_s3 + $0x14] ss:$8 sps:$4 sm:$0xff]   ;;  %vm472_vm0 = vcmask 130048   ;;  %v677_v36 = vlaneseq }
   0xf   : > { %476 = vmatprep.subr.bf16.mxu0 %v1053_v0  ;;  %529 = vmatprep.subr.bf16.mxu1 %v1053_v0  ;;  %s946_s29 = smul.u32 20, %s1306_s22  ;;  %s917_s30 = sshll.u32 %s1308_s28, 1  ;;  %v1009_v5 = vld [vmem:[%s1285_s3 + $0x4] ss:$8 sps:$4 sm:$0xff]   ;;  %v1004_v23 = vld [vmem:[%s1285_s3 + $0x10] ss:$8 sps:$4 sm:$0xff]  }
  0x10   : > { %999 = vset.pattern.permute.xlu0 %v1053_v0  ;;  %1000 = vset.pattern.permute.xlu1 %v1053_v0  ;;  %s347_s14 = scalar_select %p346_p7, %s1035_s21, 9  ;;  %v660_v6 = vld [vmem:[%s1286_s4] sm:$0xff]  ;;  %v661_v7 = vld [vmem:[%s1286_s4 + $0x8] sm:$0xff]  ;;  %v678_v39 = vand.u32 127, %v677_v36  ;;  %vm674_vm5 = vcmask 637952   ;;  %v1062_v58 = vmov 0.0  }
  0x11   : > { %s360_s7 = sadd.s32 %s946_s29, %s917_s30  ;;  %s1310_s15 = smov (!%p367_p8, %s364_s15), 9  ;;  %933 = vmatprep.mubr.msk.bf16.mxu0 %vm472_vm0, %v1006_v4  ;;  %936 = vmatprep.mubr.msk.bf16.mxu1 %vm472_vm0, %v1009_v5  ;;  %v1010_v25 = vld [vmem:[%s1285_s3 + $0x24] ss:$8 sps:$4 sm:$0xff]   ;;  %v1007_v31 = vld [vmem:[%s1285_s3] ss:$8 sps:$4 sm:$0xff]   ;;  %vm714_vm6 = vcmask 7168  }
  0x12   : > { %s918_s8 = sshll.u32 %s360_s7, 2  ;;  %s915_s16 = sshll.u32 %s347_s14, 1  ;;  %v1012_v35 = vld [vmem:[%s1285_s3 + $0x20] ss:$8 sps:$4 sm:$0xff]   ;;  %v1241_v42 = vmul.u32.u64.low 3435973837, %v678_v39  ;;  %v1242_v43 = vmul.u32.u64.high 3435973837, %v678_v39, %v1241_v42 }
  0x13   : > { %s362_s11 = scalar_lea.vmem %s1283_s1, %s918_s8  ;;  %s350_s17 = sadd.s32 %s946_s29, %s915_s16  ;;  %vm717_vm7 = vcmask 15360  }
  0x14   : > { %v1141_v1 = vld [vmem:[%s362_s11] sm:$0xff]   ;;  %s916_s20 = sshll.u32 %s350_s17, 2  ;;  %s1058_s8 = smov 118   ;;  %v685_v44 = vshrl.u32 %v1242_v43, 3 }
  0x15   : > { %454 = vrot.lane.b32.xlu0 %v1141_v1, %s1291_s12  ;;  %448 = vrot.lane.b32.xlu1 %v1141_v1, %s1289_s13  ;;  %s352_s7 = scalar_lea.vmem %s1282_s0, %s916_s20  ;;  %s1059_s9 = smov 126  }
  0x16   : > { %s919_s10 = sshll.u32 %s1310_s15, 1  ;;  %v1157_v2 = vld [vmem:[%s352_s7] sm:$0xff]   ;;  %s1060_s12 = smov 127   ;;  %v686_v47 = vmul.u32 10, %v685_v44 }
  0x17   : > { %s371_s11 = sadd.s32 %s946_s29, %s919_s10  ;;  %s1061_s20 = smov 106  }
  0x18   : > { %s920_s14 = sshll.u32 %s371_s11, 2  ;;  %s1293_s28 = smov 107   ;;  %v687_v50 = vsub.s32 %v678_v39, %v686_v47 }
  0x19   : > { %451 = vrot.lane.b32.xlu0 %v1141_v1, %s1056_s18  ;;  %445 = vrot.lane.b32.xlu1 %v1141_v1, %s1057_s19  ;;  %s373_s17 = scalar_lea.vmem %s1284_s2, %s920_s14  ;;  %s1294_s13 = smov 116  }
  0x1a   : > { %v1164_v3 = vld [vmem:[%s373_s17] sm:$0xff]   ;;  %p377_p9 = scmp.lt.s32.totalorder %s1035_s21, 7  ;;  %vm690_vm1 = vcmp.ne.s32.totalorder %v687_v50, 0  ;;  %vm691_vm2 = vcmp.lt.s32.totalorder %v687_v50, 0  ;;  %v693_v51 = vadd.s32 10, %v687_v50  ;;  %s922_s15 = sshll.u32 %s1306_s22, 4 }
  0x1b   : > { %vm692_vm3 = vmand %vm691_vm2, %vm690_vm1 }
  0x1c   : > { %s1312_s21 = smov (!%p377_p9, %s1035_s21), 7  ;;  %v694_v52 = vsel %vm692_vm3, %v693_v51, %v687_v50 }
  0x1d   : > { %442 = vrot.lane.b32.xlu0 %v1141_v1, %s1058_s8  ;;  %439 = vrot.lane.b32.xlu1 %v1141_v1, %s1059_s9  ;;  %s921_s29 = sshll.u32 %s1312_s21, 1  ;;  %vm695_vm4 = vcmp.lt.s32.totalorder %v694_v52, 8 }
  0x1e   : > { %v943_v59 = vsel %vm695_vm4, 1.0, %v1062_v58 }
  0x21   : > { %436 = vrot.lane.b32.xlu0 %v1141_v1, %s1060_s12  ;;  %457 = vrot.lane.b32.xlu1 %v1141_v1, %s1061_s20 }
  0x25   : > { %420 = vrot.lane.b32.xlu0 %v1157_v2, %s1293_s28  ;;  %596 = vrot.lane.b32.xlu1 %v1164_v3, %s1293_s28 }
  0x29   : > { %417 = vrot.lane.b32.xlu0 %v1157_v2, %s1056_s18  ;;  %593 = vrot.lane.b32.xlu1 %v1164_v3, %s1056_s18 }
  0x2d   : > { %414 = vrot.lane.b32.xlu0 %v1157_v2, %s1294_s13  ;;  %590 = vrot.lane.b32.xlu1 %v1164_v3, %s1294_s13  ;;  %s1248_s13 = sadd.s32 %s922_s15, %s921_s29 }
  0x2e   : > { %s923_s30 = sshll.u32 %s1248_s13, 3 }
  0x31   : > { %411 = vrot.lane.b32.xlu0 %v1157_v2, %s1057_s19  ;;  %587 = vrot.lane.b32.xlu1 %v1164_v3, %s1057_s19  ;;  %s383_s19 = scalar_lea.vmem %s1287_s5, %s923_s30 }
  0x35   : > { %408 = vrot.lane.b32.xlu0 %v1157_v2, %s1058_s8  ;;  %584 = vrot.lane.b32.xlu1 %v1164_v3, %s1058_s8  ;;  %s392_s8 = scalar_lea.vmem %s1288_s6, %s923_s30 }
  0x39   : > { %405 = vrot.lane.b32.xlu0 %v1157_v2, %s1059_s9  ;;  %581 = vrot.lane.b32.xlu1 %v1164_v3, %s1059_s9 }
  0x3d   : > { %402 = vrot.lane.b32.xlu0 %v1157_v2, %s1060_s12  ;;  %578 = vrot.lane.b32.xlu1 %v1164_v3, %s1060_s12 }
  0x41   : > { %423 = vrot.lane.b32.xlu0 %v1157_v2, %s1061_s20  ;;  %599 = vrot.lane.b32.xlu1 %v1164_v3, %s1061_s20 }
  0x45   : > { %664 = vperm.xlu0 %999, %v660_v6   ;;  %669 = vperm.xlu1 %1000, %v661_v7  }
  0x87   : > { %v455_v8 = vpop.permute.xlu0 %454  ;;  %v449_v9 = vpop.permute.xlu1 %448 }
  0x88   : > { %477 = vmatpush1.bf16.msra.mxu0 %v455_v8 }
  0x89   : > { %478 = vmatprep.subr.bf16.mxu0 %v1053_v0 }
  0x8b   : > { %v452_v10 = vpop.permute.xlu0 %451  ;;  %v446_v12 = vpop.permute.xlu1 %445 }
  0x8c   : > { %479 = vmatpush1.bf16.msra.mxu0 %v452_v10 }
  0x8d   : > { %480 = vmatprep.subr.bf16.mxu0 %v1053_v0 }
  0x8f   : > { %v443_v11 = vpop.permute.xlu0 %442  ;;  %v440_v14 = vpop.permute.xlu1 %439 }
  0x90   : > { %481 = vmatpush1.bf16.msra.mxu0 %v449_v9 }
  0x91   : > { %482 = vmatprep.subr.bf16.mxu0 %v1053_v0 }
  0x93   : > { %v437_v13 = vpop.permute.xlu0 %436  ;;  %v458_v16 = vpop.permute.xlu1 %457 }
  0x94   : > { %483 = vmatpush1.bf16.msra.mxu0 %v446_v12 }
  0x95   : > { %484 = vmatprep.subr.bf16.mxu0 %v1053_v0 }
  0x97   : > { %v421_v15 = vpop.permute.xlu0 %420  ;;  %v597_v18 = vpop.permute.xlu1 %596 }
  0x98   : > { %485 = vmatpush1.bf16.msra.mxu0 %v443_v11  ;;  %530 = vmatpush1.bf16.msra.mxu1 %v421_v15 }
  0x99   : > { %486 = vmatprep.subr.bf16.mxu0 %v1053_v0  ;;  %531 = vmatprep.subr.bf16.mxu1 %v1053_v0 }
  0x9b   : > { %v418_v17 = vpop.permute.xlu0 %417  ;;  %v594_v21 = vpop.permute.xlu1 %593 }
  0x9c   : > { %487 = vmatpush1.bf16.msra.mxu0 %v440_v14  ;;  %532 = vmatpush1.bf16.msra.mxu1 %v418_v17 }
  0x9d   : > { %488 = vmatprep.subr.bf16.mxu0 %v1053_v0  ;;  %533 = vmatprep.subr.bf16.mxu1 %v1053_v0 }
  0x9f   : > { %v415_v19 = vpop.permute.xlu0 %414  ;;  %v591_v24 = vpop.permute.xlu1 %590 }
  0xa0   : > { %489 = vmatpush1.bf16.msra.mxu0 %v437_v13  ;;  %534 = vmatpush1.bf16.msra.mxu1 %v415_v19 }
  0xa1   : > { %490 = vmatprep.subr.bf16.mxu0 %v1053_v0  ;;  %535 = vmatprep.subr.bf16.mxu1 %v1053_v0 }
  0xa3   : > { %v412_v20 = vpop.permute.xlu0 %411  ;;  %v588_v28 = vpop.permute.xlu1 %587 }
  0xa4   : > { %491 = vmatpush1.bf16.msra.mxu0 %v1141_v1  ;;  %536 = vmatpush1.bf16.msra.mxu1 %v412_v20 }
  0xa5   : > { %506 = vmatprep.subr.bf16.mxu0 %v1053_v0  ;;  %537 = vmatprep.subr.bf16.mxu1 %v1053_v0 }
  0xa7   : > { %v409_v22 = vpop.permute.xlu0 %408  ;;  %v585_v30 = vpop.permute.xlu1 %584 }
  0xa8   : > { %507 = vmatpush2.bf16.msra.mxu0 %v458_v16  ;;  %538 = vmatpush1.bf16.msra.mxu1 %v409_v22 }
  0xa9   : > { %539 = vmatprep.subr.bf16.mxu1 %v1053_v0  ;;  %617 = vmatprep.subr.bf16.mxu0 %v1053_v0 }
  0xab   : > { %509 = vmatmul.mubr.bf16.vlgmr.msra.gmra.mxu0 %v1004_v23  ;;  %v406_v26 = vpop.permute.xlu0 %405  ;;  %v582_v32 = vpop.permute.xlu1 %581 }
  0xac   : > { %540 = vmatpush1.bf16.msra.mxu1 %v406_v26  ;;  %618 = vmatpush1.bf16.msra.mxu0 %v597_v18 }
  0xad   : > { %541 = vmatprep.subr.bf16.mxu1 %v1053_v0  ;;  %619 = vmatprep.subr.bf16.mxu0 %v1053_v0 }
  0xae   : > { %942 = vmatprep.mubr.msk.bf16.mxu0 %vm472_vm0, %v1010_v25 }
  0xaf   : > { %v403_v27 = vpop.permute.xlu0 %402  ;;  %v579_v33 = vpop.permute.xlu1 %578 }
  0xb0   : > { %542 = vmatpush1.bf16.msra.mxu1 %v403_v27  ;;  %620 = vmatpush1.bf16.msra.mxu0 %v594_v21 }
  0xb1   : > { %543 = vmatprep.subr.bf16.mxu1 %v1053_v0  ;;  %621 = vmatprep.subr.bf16.mxu0 %v1053_v0 }
  0xb3   : > { %v424_v29 = vpop.permute.xlu0 %423  ;;  %v600_v34 = vpop.permute.xlu1 %599 }
  0xb4   : > { %544 = vmatpush1.bf16.msra.mxu1 %v1157_v2  ;;  %622 = vmatpush1.bf16.msra.mxu0 %v591_v24 }
  0xb5   : > { %559 = vmatprep.subr.bf16.mxu1 %v1053_v0  ;;  %623 = vmatprep.subr.bf16.mxu0 %v1053_v0 }
  0xb8   : > { %560 = vmatpush2.bf16.msra.mxu1 %v424_v29  ;;  %624 = vmatpush1.bf16.msra.mxu0 %v588_v28 }
  0xb9   : > { %625 = vmatprep.subr.bf16.mxu0 %v1053_v0 }
  0xbb   : > { %562 = vmatmul.mubr.bf16.vlgmr.msra.gmra.mxu1 %v1007_v31 }
  0xbc   : > { %626 = vmatpush1.bf16.msra.mxu0 %v585_v30 }
  0xbd   : > { %627 = vmatprep.subr.bf16.mxu0 %v1053_v0 }
  0xc0   : > { %628 = vmatpush1.bf16.msra.mxu0 %v582_v32  ;;  %v665_v55 = vpop.permute.xlu0 %664  ;;  %v670_v63 = vpop.permute.xlu1 %669 }
  0xc1   : > { %629 = vmatprep.subr.bf16.mxu0 %v1053_v0 }
  0xc4   : > { %630 = vmatpush1.bf16.msra.mxu0 %v579_v33 }
  0xc5   : > { %631 = vmatprep.subr.bf16.mxu0 %v1053_v0 }
  0xc8   : > { %632 = vmatpush1.bf16.msra.mxu0 %v1164_v3 }
  0xc9   : > { %647 = vmatprep.subr.bf16.mxu0 %v1053_v0 }
  0xcc   : > { %648 = vmatpush2.bf16.msra.mxu0 %v600_v34 }
  0xcf   : > { %650 = vmatmul.mubr.bf16.vlgmr.msra.gmra.mxu0 %v1012_v35 }
 0x16b   : > { %v510_v37 = vpop.f32.mrf.mxu0 }
 0x16d   : > { %v512_v38 = vpop.f32.mrf.mxu0 }
 0x16f   : > { %v513_v40 = vpop.f32.mrf.mxu0 }
 0x171   : > { %v515_v41 = vpop.f32.mrf.mxu0 }
 0x17b   : > { %v563_v45 = vpop.f32.mrf.mxu1 }
 0x17c   : > { %v564_v53 = vadd.f32 %v563_v45, %v510_v37 }
 0x17d   : > { %v565_v46 = vpop.f32.mrf.mxu1 }
 0x17f   : > { %v566_v48 = vpop.f32.mrf.mxu1 }
 0x180   : > { %v567_v60 = vadd.f32 %v566_v48, %v513_v40 }
 0x181   : > { %v568_v49 = vpop.f32.mrf.mxu1 }
 0x18f   : > { %v651_v54 = vpop.f32.mrf.mxu0 }
 0x190   : > { %v658_v56 = vadd.f32 %v651_v54, %v564_v53 }
 0x191   : > { %v653_v57 = vpop.f32.mrf.mxu0 }
 0x192   : > { %v672_v61 = vadd.f32 %v665_v55, %v658_v56 }
 0x193   : > { %v654_v62 = vpop.f32.mrf.mxu0 }
 0x194   : > { %675 = vst.msk [vmem:[%s383_s19] sm:$0xff] %vm674_vm5, %v672_v61  ;;  %v659_v0 = vadd.f32 %v654_v62, %v567_v60  ;;  %v698_v1 = vmul.f32 %v943_v59, %v672_v61 }
 0x195   : > { %v656_v2 = vpop.f32.mrf.mxu0 }
 0x196   : > { %v673_v3 = vadd.f32 %v670_v63, %v659_v0  ;;  %v700_v4 = vsel %vm674_vm5, %v698_v1, 0.0  ;;  %v706_v8 = vmul.f32 %v698_v1, %v672_v61 }
 0x197   : > { %701 = vadd.xlane.f32.xlu1 %v700_v4 }
 0x198   : > { %676 = vst.msk [vmem:[%s383_s19 + $0x8] sm:$0xff] %vm674_vm5, %v673_v3  ;;  %v699_v5 = vmul.f32 %v943_v59, %v673_v3  ;;  %v708_v10 = vsel %vm674_vm5, %v706_v8, 0.0 }
 0x19a   : > { %v703_v6 = vsel %vm674_vm5, %v699_v5, 0.0  ;;  %v707_v7 = vmul.f32 %v699_v5, %v673_v3 }
 0x19b   : > { %704 = vadd.xlane.f32.xlu0 %v703_v6 }
 0x19c   : > { %v711_v9 = vsel %vm674_vm5, %v707_v7, 0.0 }
 0x19d   : > { %712 = vadd.xlane.f32.xlu1 %v711_v9 }
 0x19f   : > { %709 = vadd.xlane.f32.xlu0 %v708_v10 }
 0x220   : > { %v702_v11 = vpop.xlane.xlu1 %701 }
 0x224   : > { %v705_v12 = vpop.xlane.xlu0 %704 }
 0x226   : > { %v713_v13 = vpop.xlane.xlu1 %712 }
 0x227   : > { %v716_v14 = vsel %vm714_vm6, %v705_v12, %v713_v13 }
 0x228   : > { %719 = vst.msk [vmem:[%s392_s8 + $0x8] sm:$0xff] %vm717_vm7, %v716_v14  ;;  %v710_v15 = vpop.xlane.xlu0 %709 }
 0x229   : > { %v715_v16 = vsel %vm714_vm6, %v702_v11, %v710_v15 }
 0x22a   : > { %718 = vst.msk [vmem:[%s392_s8] sm:$0xff] %vm717_vm7, %v715_v16 }
 0x22b PF: > { %s17_s25 = sadd.s32 1, %s1051_s25   ;;  %s1295_s21 = smov %s1043_s23 }
 0x22c   : > { %p14_p10 = scmp.ge.s32.totalorder %s17_s25, 18   ;;  %s1296_s22 = smov %s1047_s24 }
 0x22d   : > { %s1297_s23 = smov %s1300_s26  ;;  %s1298_s24 = smov %s1304_s27 }
 0x22e   :  { %16 = sbr.rel (!%p14_p10) target bundleno = 3 (0x3), region = 90 }

// kernel: _lambda_.7
= control target key start
LH: loop header
LB: loop body
LE: loop exit
PB: predicated region body
PF: predicated region fallthrough
CT: control target
= control target key end

     0   :  { %s800_s21 = smov 0   ;;  %s802_s22 = smov 0   ;;  %s882_s0 = inlined_call_operand.vmem [shape: f32[2,8,16,78], index: 0, kind: input, shape index: {}]   ;;  %s883_s1 = inlined_call_operand.vmem [shape: f32[2,16,1], index: 1, kind: input, shape index: {}]   ;;  %s884_s2 = inlined_call_operand.vmem [shape: f32[2,16,1], index: 2, kind: input, shape index: {}]   ;;  %s885_s3 = inlined_call_operand.vmem [shape: bf16[2,10,4,100], index: 3, kind: input, shape index: {}]   ;;  %s886_s4 = inlined_call_operand.vmem [shape: bf16[16,4], index: 4, kind: input, shape index: {}]   ;;  %s887_s5 = inlined_call_operand.vmem [shape: f32[16,1], index: 5, kind: input, shape index: {}]   ;;  %s888_s6 = inlined_call_operand.vmem [shape: f32[2,8,16,78], index: 6, kind: output, shape index: {}]  }
   0x1   :  { %s804_s23 = smov 0   ;;  %s806_s24 = smov 0  }
   0x2   :  { %s808_s25 = smov 0  }
   0x3 LB: > { %s25_s26 = sadd.s32 1, %s751_s23  ;;  %s28_s27 = sadd.s32 1, %s755_s24  ;;  %s759_s25 = sphi %s808_s25, %s16_s25   ;;  %s755_s24 = sphi %s806_s24, %s892_s24   ;;  %s751_s23 = sphi %s804_s23, %s891_s23   ;;  %s747_s22 = sphi %s802_s22, %s890_s22   ;;  %s743_s21 = sphi %s800_s21, %s889_s21  }
   0x4   : > { %p26_p0 = scmp.ge.s32.totalorder %s25_s26, 8  ;;  %p636_p1 = scmp.ge.s32.totalorder %s759_s25, 1 }
   0x5   : > { %p271_p2 = scmp.lt.s32.totalorder %s759_s25, 17 }
   0x6   : > { %s894_s26 = smov (%p26_p0, %s25_s26), 0  ;;  %s896_s27 = smov (!%p26_p0, %s28_s27), %s755_s24 }
   0x7   : > { %p272_p3 = pnand %p636_p1, %p271_p2  ;;  %p30_p4 = scmp.ge.s32.totalorder %s896_s27, 2 }
   0x8   : > { %p328_p5 = scmp.lt.s32.totalorder (!%p272_p3), %s747_s22, 1  ;;  %s347_s28 = sadd.s32 (!%p272_p3), 1, %s743_s21 }
   0x9   : > { %s898_s27 = smov (%p30_p4, %s896_s27), 0  ;;  %275 = sbr.rel (%p272_p3) target bundleno = 342 (0x156), region = 44 }
   0xa   : > { %p350_p6 = scmp.lt.s32.totalorder (!%p272_p3), %s347_s28, 9  ;;  %s764_s18 = smov (!%p272_p3), 117  }
   0xb   : > { %p330_p7 = scmp.lt.s32.totalorder (!%p272_p3), %s743_s21, 7 }
   0xe   : > { %v761_v0 = vmov 0   ;;  %v762_v1 = vmov 0.0   ;;  %s900_s22 = smov (!%p328_p5, %s747_s22), 1  ;;  %vm763_vm0 = vmmov 0   ;;  %s902_s28 = smov (!%p350_p6, %s347_s28), 9  ;;  %v414_v7 = vld [vmem:[%s887_s5] sm:$0xff] }
   0xf   : > { %711 = vset.pattern.permute.xlu1 %v761_v0  ;;  %659 = vmatprep.subr.bf16.mxu0 %v762_v1  ;;  %s665_s29 = smul.u32 10, %s900_s22  ;;  %s833_s30 = sshll.u32 %s900_s22, 4  ;;  %v415_v8 = vld [vmem:[%s887_s5 + $0x8] sm:$0xff]  ;;  %vm445_vm1 = vcmask 1041408   ;;  %v712_v11 = vld [vmem:[%s886_s4] sm:$0xff]   ;;  %vm441_vm2 = vcmask 31744  }
  0x10   : > { %710 = vset.pattern.permute.xlu0 %v761_v0  ;;  %661 = vmatprep.mubr.msk.bf16.mxu0 %vm763_vm0, %v762_v1  ;;  %s341_s9 = scalar_lea.vmem %s883_s1, %s833_s30  ;;  %s346_s12 = scalar_lea.vmem %s884_s2, %s833_s30  ;;  %vm492_vm3 = vcmask 637952  }
  0x11   : > { %s353_s13 = sadd.s32 %s665_s29, %s902_s28  ;;  %v370_v2 = vld [vmem:[%s341_s9 + $0x8] sm:$0xff]  ;;  %v383_v3 = vld [vmem:[%s346_s12] sm:$0xff]  ;;  %s904_s21 = smov (!%p330_p7, %s743_s21), 7 }
  0x12   : > { %s644_s14 = sshll.u32 %s353_s13, 1  ;;  %378 = vperm.xlu1 %711, %v370_v2   ;;  %v369_v5 = vld [vmem:[%s341_s9] sm:$0xff]  ;;  %v384_v6 = vld [vmem:[%s346_s12 + $0x8] sm:$0xff]  ;;  %s637_s8 = sshll.u32 %s904_s21, 1 }
  0x13   : > { %s355_s17 = scalar_lea.vmem %s885_s3, %s644_s14  ;;  %s858_s9 = sadd.s32 %s833_s30, %s637_s8 }
  0x14   : > { %v651_v4 = vld.sshfl [vmem:[%s355_s17] sm:$0x3 pattern:$0x76325410]  ;;  %s639_s10 = sshll.u32 %s858_s9, 3 }
  0x15   : > { %439 = vrot.lane.b32.xlu0 %v651_v4, %s764_s18  ;;  %s336_s13 = scalar_lea.vmem %s882_s0, %s639_s10  ;;  %s365_s14 = scalar_lea.vmem %s888_s6, %s639_s10 }
  0x16   : > { %387 = vperm.xlu1 %711, %v383_v3   ;;  %v367_v14 = vld [vmem:[%s336_s13] sm:$0xff]  ;;  %v368_v17 = vld [vmem:[%s336_s13 + $0x8] sm:$0xff] }
  0x19   : > { %373 = vperm.xlu0 %710, %v369_v5  }
  0x1a   : > { %392 = vperm.xlu1 %711, %v384_v6  }
  0x1d   : > { %418 = vperm.xlu0 %710, %v414_v7  }
  0x1e   : > { %423 = vperm.xlu1 %711, %v415_v8  }
  0x87   : > { %v440_v9 = vpop.permute.xlu0 %439 }
  0x88   : > { %v447_v10 = vsel %vm445_vm1, %v440_v9, 0 }
  0x89   : > { %660 = vmatpush3.bf16.msra.mxu0 %v447_v10 }
  0x8c   : > { %662 = vmatmul.mubr.msk.bf16.vlgmr.msra.gmra.mxu0 %vm441_vm2, %v712_v11 }
  0x8d   : > { %v379_v12 = vpop.permute.xlu1 %378 }
  0x8e   : > { %v382_v18 = vmul.f32 %v379_v12, %v368_v17 }
  0x91   : > { %v388_v15 = vpop.permute.xlu1 %387 }
  0x94   : > { %v374_v13 = vpop.permute.xlu0 %373 }
  0x95   : > { %v381_v16 = vmul.f32 %v374_v13, %v367_v14  ;;  %v393_v20 = vpop.permute.xlu1 %392 }
  0x96   : > { %v396_v22 = vadd.f32 %v393_v20, %v382_v18 }
  0x97   : > { %v395_v19 = vadd.f32 %v388_v15, %v381_v16 }
  0x98   : > { %v649_v23 = vmul.f32 -1.442695, %v396_v22  ;;  %v419_v29 = vpop.permute.xlu0 %418 }
  0x99   : > { %v648_v21 = vmul.f32 -1.442695, %v395_v19  ;;  %v424_v36 = vpop.permute.xlu1 %423 }
  0x9b   : > { %713 = vpow2.f32 %v648_v21 }
  0x9c   : > { %715 = vpow2.f32 %v649_v23 }
  0xa8   : > { %v714_v24 = vpop.eup %713 }
  0xa9   : > { %v403_v25 = vadd.f32 1.0, %v714_v24  ;;  %v716_v26 = vpop.eup %715 }
  0xaa   : > { %v404_v27 = vadd.f32 1.0, %v716_v26 }
  0xab   : > { %717 = vrcp.f32 %v403_v25 }
  0xac   : > { %719 = vrcp.f32 %v404_v27 }
  0xb8   : > { %v718_v28 = vpop.eup %717 }
  0xb9   : > { %v409_v31 = vmul.f32 %v718_v28, %v395_v19  ;;  %v720_v33 = vpop.eup %719 }
  0xba   : > { %v410_v38 = vmul.f32 %v720_v33, %v396_v22 }
 0x14c   : > { %v483_v30 = vpop.f32.mrf.mxu0 }
 0x14d   : > { %v484_v32 = vadd.f32 %v483_v30, %v419_v29 }
 0x14e   : > { %v663_v34 = vpop.f32.mrf.mxu0 }
 0x14f   : > { %v490_v35 = vadd.f32 %v484_v32, %v409_v31 }
 0x150   : > { %v486_v37 = vpop.f32.mrf.mxu0 }
 0x151   : > { %493 = vst.msk [vmem:[%s365_s14] sm:$0xff] %vm492_vm3, %v490_v35  ;;  %v487_v39 = vadd.f32 %v486_v37, %v424_v36 }
 0x152   : > { %v664_v40 = vpop.f32.mrf.mxu0 }
 0x153   : > { %v491_v41 = vadd.f32 %v487_v39, %v410_v38 }
 0x155   : > { %494 = vst.msk [vmem:[%s365_s14 + $0x8] sm:$0xff] %vm492_vm3, %v491_v41 }
 0x156 PF: > { %s16_s25 = sadd.s32 1, %s759_s25   ;;  %s889_s21 = smov %s751_s23 }
 0x157   : > { %p13_p8 = scmp.ge.s32.totalorder %s16_s25, 18   ;;  %s890_s22 = smov %s755_s24 }
 0x158   : > { %s891_s23 = smov %s894_s26  ;;  %s892_s24 = smov %s898_s27 }
 0x159   :  { %15 = sbr.rel (!%p13_p8) target bundleno = 3 (0x3), region = 83 }

</bundles_post_ra>
